<compile_context>
chip_gen: v7x
topology: tpu7x:2x2x1
jax: 0.10.0
libtpu: 0.0.40
codegen_flags: <defaults>
</compile_context>

<pallas_src>
import numpy as np
import jax
import jax.numpy as jnp
from jax.experimental import pallas as pl
from jax.experimental.pallas import tpu as pltpu

# ----------------------------- config (small synthetic sizes) ----------------
B, S = 2, 8            # batch, sequence length           -> N = B*S tokens
H = 32                 # base-model hidden size
F = 64                 # FFN intermediate size
V = 48                 # base-model (token) vocab size
CV = 20                # char vocab size (0 == PAD_CHAR)
E = 16                 # char embedding size
L = 8                  # max chars per word (multiple of 8 -> tile-aligned time axis)
D = 32                 # generator hidden size
LANE = 128             # lane-dense output width

VMEM_SPEC = pl.BlockSpec(memory_space=pltpu.MemorySpace.VMEM)


# ----------------------------- fused Pallas kernel ----------------------------
def _fused_tdt_kernel(char_embs_ref, cnt_ref, vec_w_ref, vec_b_ref,
                      w1_ref, b1_ref, w2_ref, b2_ref, wo_ref, bo_ref,
                      gen_wh_ref, gen_we_ref, gen_b_ref, gen_wc_ref, gen_bc_ref,
                      vec_hid_ref, logits_ref, gen_ref):
    """Fused TdtEmbedder.vectorizer + base LM + TdtGenerator.

    char_embs: [N, L, E]  (PAD rows already zero)     cnt: [N, 1]
    vec_hid_ref: [N, 128]  (cols 0:H = word vecs, H:2H = LM hidden)
    logits_ref:  [N, 128]  (cols 0:V valid)
    gen_ref:     [N, L, 128] (time 0:T-1 and cols 0:CV valid)
    """
    # ---- vectorizer: masked mean (PAD rows are zero) + linear ----------------
    ce = char_embs_ref[...]                                 # [N, L, E] f32
    summed = jnp.sum(ce, axis=1)                            # [N, E]
    inv_cnt = pl.reciprocal(cnt_ref[...], approx=True)      # EUP slot
    mean = summed * inv_cnt                                 # [N, E]
    inp_embs = (jnp.dot(mean.astype(jnp.bfloat16), vec_w_ref[...],
                        preferred_element_type=jnp.float32) + vec_b_ref[...])  # [N, H]

    # ---- base LM stand-in: FFN + residual + layernorm + LM head --------------
    x = inp_embs
    h1 = jax.nn.gelu(
        jnp.dot(x.astype(jnp.bfloat16), w1_ref[...],
                preferred_element_type=jnp.float32) + b1_ref[...],
        approximate=True)
    ffn = jnp.dot(h1.astype(jnp.bfloat16), w2_ref[...],
                  preferred_element_type=jnp.float32) + b2_ref[...]
    y = x + ffn
    mu = jnp.mean(y, axis=-1, keepdims=True)
    var = jnp.mean((y - mu) ** 2, axis=-1, keepdims=True)
    hidden = (y - mu) * jax.lax.rsqrt(var + 1e-5)           # [N, H] f32

    # LM head: wo is zero-padded to 128 lanes -> full-width unmasked store.
    logits_ref[...] = (jnp.dot(hidden.astype(jnp.bfloat16), wo_ref[...],
                               preferred_element_type=jnp.float32) + bo_ref[...])

    # pack word vectors + hidden into one lane-dense [N, 128] output slab
    n = inp_embs.shape[0]
    pad = jnp.zeros((n, vec_hid_ref.shape[1] - 2 * H), jnp.float32)
    vec_hid_ref[...] = jnp.concatenate([inp_embs, hidden, pad], axis=-1)

    # ---- generator: teacher-forced char decoder logits (all tokens) ----------
    # TODO(synk): on v5e, fold gen_wh/gen_we into one [H+E, D] weight (single
    # K=48 MXU push); kept as two dots here for lowering simplicity.
    hvec = jnp.dot(hidden.astype(jnp.bfloat16), gen_wh_ref[...],
                   preferred_element_type=jnp.float32)      # [N, D]
    n2, tp, e = char_embs_ref.shape                         # tp == L (multiple of 8)
    emb2 = ce.reshape(n2 * tp, e)                           # tile-aligned reshape
    he = jnp.dot(emb2.astype(jnp.bfloat16), gen_we_ref[...],
                 preferred_element_type=jnp.float32)        # [N*L, D]
    hgen = jax.nn.gelu(he.reshape(n2, tp, -1) + hvec[:, None, :] + gen_b_ref[...],
                       approximate=True)                    # [N, L, D]
    glog = (jnp.dot(hgen.reshape(n2 * tp, hgen.shape[-1]).astype(jnp.bfloat16),
                    gen_wc_ref[...], preferred_element_type=jnp.float32)
            + gen_bc_ref[...])                              # [N*L, 128]
    gen_ref[...] = glog.reshape(n2, tp, -1)


def fused_tdt(char_embs, cnt, p):
    """Single pallas_call for the whole numeric forward path.

    # TODO(synk): at production sizes add a grid over the token dim with
    # dimension_semantics=("parallel",...) (megacore / v7x 2-TC) and tile the
    # LM-head V dimension with an explicit vmem_limit_bytes (64 MiB on v7x).
    """
    n = char_embs.shape[0]
    return pl.pallas_call(
        _fused_tdt_kernel,
        out_shape=(jax.ShapeDtypeStruct((n, LANE), jnp.float32),
                   jax.ShapeDtypeStruct((n, LANE), jnp.float32),
                   jax.ShapeDtypeStruct((n, L, LANE), jnp.float32)),
        in_specs=[VMEM_SPEC] * 15,
        out_specs=(VMEM_SPEC, VMEM_SPEC, VMEM_SPEC),
    )(char_embs, cnt,
      p["vec_w"], p["vec_b"], p["w1"], p["b1"], p["w2"], p["b2"],
      p["wo_p"], p["bo_p"], p["gen_wh"], p["gen_we"], p["gen_b"],
      p["gen_wc_p"], p["gen_bc_p"])


# ----------------------------- deterministic parameters -----------------------
def init_params():
    k = jax.random.PRNGKey(0)
    ks = jax.random.split(k, 12)

    char_emb = jax.random.normal(ks[1], (CV, E), jnp.float32) * 0.02
    char_emb = char_emb.at[0].set(0.0)       # PAD row zero -> plain sum == masked sum

    wo = jax.random.normal(ks[5], (H, V), jnp.float32) * 0.1
    wo_p = jnp.zeros((H, LANE), jnp.float32).at[:, :V].set(wo).astype(jnp.bfloat16)
    gen_wc = jax.random.normal(ks[8], (D, CV), jnp.float32) * 0.1
    gen_wc_p = jnp.zeros((D, LANE), jnp.float32).at[:, :CV].set(gen_wc).astype(jnp.bfloat16)

    return {
        # embedding tables (glue lookups)
        "tok_emb": jax.random.normal(ks[0], (V, H), jnp.float32) * 0.02,
        "char_emb": char_emb,
        # vectorizer (weights bf16 for MXU, biases f32)
        "vec_w": (jax.random.normal(ks[2], (E, H), jnp.float32) * 0.1).astype(jnp.bfloat16),
        "vec_b": jnp.zeros((1, H), jnp.float32),
        # base LM
        "w1": (jax.random.normal(ks[3], (H, F), jnp.float32) * 0.1).astype(jnp.bfloat16),
        "b1": jnp.zeros((1, F), jnp.float32),
        "w2": (jax.random.normal(ks[4], (F, H), jnp.float32) * 0.1).astype(jnp.bfloat16),
        "b2": jnp.zeros((1, H), jnp.float32),
        "wo_p": wo_p,
        "bo_p": jnp.zeros((1, LANE), jnp.float32),
        # generator
        "gen_wh": (jax.random.normal(ks[6], (H, D), jnp.float32) * 0.1).astype(jnp.bfloat16),
        "gen_we": (jax.random.normal(ks[7], (E, D), jnp.float32) * 0.1).astype(jnp.bfloat16),
        "gen_b": jnp.zeros((1, D), jnp.float32),
        "gen_wc_p": gen_wc_p,
        "gen_bc_p": jnp.zeros((1, LANE), jnp.float32),
    }


# ----------------------------- host glue (vectorized numpy) -------------------
# TODO(synk): real TdtEmbedder derives char ids from tokenizer string forms;
# here word forms are synthesized deterministically from the token id.
def synth_char_ids(flat_ids):
    tok = flat_ids.astype(np.int64)
    lens = 2 + (tok % (L - 2))                                  # [N] in [2, L-1]
    t = np.arange(L, dtype=np.int64)[None, :]                   # [1, L]
    ids = 1 + ((tok[:, None] * 7 + t * 3) % (CV - 1))
    char_ids = np.where(t < lens[:, None], ids, 0).astype(np.int32)   # PAD = 0
    return char_ids, lens.astype(np.int32)


def build_pack_indices(out_lens_sorted, order):
    """Row/col indices replicating pack_padded_sequence(...).data ordering."""
    tmax_out = int(out_lens_sorted.max())
    rows, cols = [], []
    for t in range(tmax_out):
        k = int((out_lens_sorted > t).sum())        # lens sorted descending
        rows.append(order[:k])
        cols.append(np.full(k, t, dtype=np.int32))
    return (np.concatenate(rows).astype(np.int32),
            np.concatenate(cols).astype(np.int32))


# ----------------------------- forward (TdtWrapper.forward, action='mlm') -----
def tdt_wrapper_forward(in_ids_np, params, generate_all=True):
    b, s = in_ids_np.shape
    flat_ids = in_ids_np.reshape(-1)

    # --- TdtEmbedder glue: char ids, counts, char embeddings ------------------
    char_ids, lens = synth_char_ids(flat_ids)                       # numpy [N,L], [N]
    cnt = jnp.asarray(lens.astype(np.float32)[:, None])             # [N, 1]
    # TODO(synk): at production sizes gather char embeddings inside the kernel
    # via scalar-prefetch + index_map instead of a separate XLA take.
    char_embs = jnp.take(params["char_emb"], jnp.asarray(char_ids), axis=0)  # [N,L,E]

    # --- fused Pallas kernel: vectorizer + base LM + generator ----------------
    vec_hid, logits_p, gen_p = fused_tdt(char_embs, cnt, params)
    inp_embs = vec_hid[:, :H]
    hidden = vec_hid[:, H:2 * H]
    logits = logits_p[:, :V]

    target_embs = jnp.take(params["tok_emb"], jnp.asarray(flat_ids), axis=0)
    vec_lrn_batch = (inp_embs, target_embs)

    # mask=False path: no masked positions, labels are ignore-index everywhere.
    _mask_labels = np.full((b, s), -100, dtype=np.int32)
    # TODO(synk): max_position_embeddings abort check and attention masking are
    # config/bookkeeping only; the synthetic base LM here has no positions.

    lm_out = (jnp.float32(0.0),                       # masked-lm loss placeholder
              logits.reshape(b, s, V),                # prediction scores
              (hidden.reshape(b, s, H),))             # hidden-states tuple
    assert len(lm_out) == 3, f"Output length from LM is {len(lm_out)}"

    # --- TdtGenerator packing ---------------------------------------------------
    # TODO(synk): special-token / mask-token filtering skipped; with
    # generate_all=True every position is generated.
    if not generate_all:
        return lm_out, vec_lrn_batch, None

    tmax = int(lens.max())
    order = np.argsort(lens, kind="stable")[::-1]                   # descending length
    out_lens_sorted = lens[order] - 1
    rows, cols = build_pack_indices(out_lens_sorted, order)

    preds_full = gen_p[:, :tmax - 1, :CV]                           # [N, T-1, CV]
    packed_preds = preds_full[jnp.asarray(rows), jnp.asarray(cols)]  # one gather
    gold_outs = char_ids[:, 1:tmax]                                 # numpy
    packed_gold_np = gold_outs[rows, cols]
    assert packed_gold_np.min() >= 0                                # host-side, no sync
    assert packed_gold_np.max() < CV
    generated = (packed_preds, jnp.asarray(packed_gold_np))

    return lm_out, vec_lrn_batch, generated


# ----------------------------- main --------------------------------------------
if __name__ == "__main__":
    params = init_params()
    key = jax.random.PRNGKey(0)
    in_ids = jax.random.randint(key, (B, S), minval=0, maxval=V, dtype=jnp.int32)
    in_ids_np = np.asarray(jax.device_get(in_ids))

    lm_out, vec_lrn_batch, generated = tdt_wrapper_forward(in_ids_np, params)

    jax.block_until_ready(lm_out[1])
    jax.block_until_ready(lm_out[2][0])
    jax.block_until_ready(vec_lrn_batch[0])
    if generated is not None:
        jax.block_until_ready(generated[0])
        jax.block_until_ready(generated[1])

    # light sanity checks on shapes
    assert lm_out[1].shape == (B, S, V)
    assert lm_out[2][0].shape == (B, S, H)
    assert vec_lrn_batch[0].shape == (B * S, H)
    assert generated[0].shape[1] == CV

    print("KERNEL_OK")
</pallas_src>

<mosaic_0001>
module attributes {stable_mosaic.version = 11 : i64} {
  func.func @_fused_tdt_kernel(%arg0: memref<16x8x16xf32, #tpu.memory_space<vmem>>, %arg1: memref<16x1xf32, #tpu.memory_space<vmem>>, %arg2: memref<16x32xbf16, #tpu.memory_space<vmem>>, %arg3: memref<1x32xf32, #tpu.memory_space<vmem>>, %arg4: memref<32x64xbf16, #tpu.memory_space<vmem>>, %arg5: memref<1x64xf32, #tpu.memory_space<vmem>>, %arg6: memref<64x32xbf16, #tpu.memory_space<vmem>>, %arg7: memref<1x32xf32, #tpu.memory_space<vmem>>, %arg8: memref<32x128xbf16, #tpu.memory_space<vmem>>, %arg9: memref<1x128xf32, #tpu.memory_space<vmem>>, %arg10: memref<32x32xbf16, #tpu.memory_space<vmem>>, %arg11: memref<16x32xbf16, #tpu.memory_space<vmem>>, %arg12: memref<1x32xf32, #tpu.memory_space<vmem>>, %arg13: memref<32x128xbf16, #tpu.memory_space<vmem>>, %arg14: memref<1x128xf32, #tpu.memory_space<vmem>>, %arg15: memref<16x128xf32, #tpu.memory_space<vmem>>, %arg16: memref<16x128xf32, #tpu.memory_space<vmem>>, %arg17: memref<16x8x128xf32, #tpu.memory_space<vmem>>) attributes {dimension_semantics = [], scalar_prefetch = 0 : i64, scratch_operands = 0 : i64, tpu.core_type = #tpu.core_type<tc>} {
    %c0 = arith.constant 0 : index
    %c0_0 = arith.constant 0 : index
    %c0_1 = arith.constant 0 : index
    %0 = vector.load %arg0[%c0, %c0_0, %c0_1] : memref<16x8x16xf32, #tpu.memory_space<vmem>>, vector<16x8x16xf32>
    %cst = arith.constant dense<0.000000e+00> : vector<16x16xf32>
    %1 = vector.multi_reduction <add>, %0, %cst [1] : vector<16x8x16xf32> to vector<16x16xf32>
    %c0_2 = arith.constant 0 : index
    %c0_3 = arith.constant 0 : index
    %2 = vector.load %arg1[%c0_2, %c0_3] : memref<16x1xf32, #tpu.memory_space<vmem>>, vector<16x1xf32>
    %3 = tpu.reciprocal %2 {approx = true} : vector<16x1xf32> -> vector<16x1xf32>
    %4 = vector.broadcast %3 : vector<16x1xf32> to vector<16x16xf32>
    %5 = arith.mulf %1, %4 : vector<16x16xf32>
    %6 = arith.truncf %5 : vector<16x16xf32> to vector<16x16xbf16>
    %c0_4 = arith.constant 0 : index
    %c0_5 = arith.constant 0 : index
    %7 = vector.load %arg2[%c0_4, %c0_5] : memref<16x32xbf16, #tpu.memory_space<vmem>>, vector<16x32xbf16>
    %cst_6 = arith.constant dense<0.000000e+00> : vector<16x32xf32>
    %8 = tpu.matmul %6, %7, %cst_6 {dimension_numbers = #tpu.dot_dimension_numbers<[1], [0], [0], [1], [0, 0, 1, 1], [], []>} : vector<16x16xbf16>, vector<16x32xbf16>, vector<16x32xf32> -> vector<16x32xf32>
    %c0_7 = arith.constant 0 : index
    %c0_8 = arith.constant 0 : index
    %9 = vector.load %arg3[%c0_7, %c0_8] : memref<1x32xf32, #tpu.memory_space<vmem>>, vector<1x32xf32>
    %10 = vector.broadcast %9 : vector<1x32xf32> to vector<16x32xf32>
    %11 = arith.addf %8, %10 : vector<16x32xf32>
    %12 = arith.truncf %11 : vector<16x32xf32> to vector<16x32xbf16>
    %c0_9 = arith.constant 0 : index
    %c0_10 = arith.constant 0 : index
    %13 = vector.load %arg4[%c0_9, %c0_10] : memref<32x64xbf16, #tpu.memory_space<vmem>>, vector<32x64xbf16>
    %cst_11 = arith.constant dense<0.000000e+00> : vector<16x64xf32>
    %14 = tpu.matmul %12, %13, %cst_11 {dimension_numbers = #tpu.dot_dimension_numbers<[1], [0], [0], [1], [0, 0, 1, 1], [], []>} : vector<16x32xbf16>, vector<32x64xbf16>, vector<16x64xf32> -> vector<16x64xf32>
    %c0_12 = arith.constant 0 : index
    %c0_13 = arith.constant 0 : index
    %15 = vector.load %arg5[%c0_12, %c0_13] : memref<1x64xf32, #tpu.memory_space<vmem>>, vector<1x64xf32>
    %16 = vector.broadcast %15 : vector<1x64xf32> to vector<16x64xf32>
    %17 = arith.addf %14, %16 : vector<16x64xf32>
    %18 = arith.mulf %17, %17 : vector<16x64xf32>
    %19 = arith.mulf %17, %18 : vector<16x64xf32>
    %cst_14 = arith.constant 4.471500e-02 : f32
    %20 = vector.broadcast %cst_14 : f32 to vector<16x64xf32>
    %21 = arith.mulf %20, %19 : vector<16x64xf32>
    %22 = arith.addf %17, %21 : vector<16x64xf32>
    %cst_15 = arith.constant 0.797884583 : f32
    %23 = vector.broadcast %cst_15 : f32 to vector<16x64xf32>
    %24 = arith.mulf %23, %22 : vector<16x64xf32>
    %25 = math.tanh %24 : vector<16x64xf32>
    %cst_16 = arith.constant 1.000000e+00 : f32
    %26 = vector.broadcast %cst_16 : f32 to vector<16x64xf32>
    %27 = arith.addf %26, %25 : vector<16x64xf32>
    %cst_17 = arith.constant 5.000000e-01 : f32
    %28 = vector.broadcast %cst_17 : f32 to vector<16x64xf32>
    %29 = arith.mulf %28, %27 : vector<16x64xf32>
    %30 = arith.mulf %17, %29 : vector<16x64xf32>
    %31 = arith.truncf %30 : vector<16x64xf32> to vector<16x64xbf16>
    %c0_18 = arith.constant 0 : index
    %c0_19 = arith.constant 0 : index
    %32 = vector.load %arg6[%c0_18, %c0_19] : memref<64x32xbf16, #tpu.memory_space<vmem>>, vector<64x32xbf16>
    %cst_20 = arith.constant dense<0.000000e+00> : vector<16x32xf32>
    %33 = tpu.matmul %31, %32, %cst_20 {dimension_numbers = #tpu.dot_dimension_numbers<[1], [0], [0], [1], [0, 0, 1, 1], [], []>} : vector<16x64xbf16>, vector<64x32xbf16>, vector<16x32xf32> -> vector<16x32xf32>
    %c0_21 = arith.constant 0 : index
    %c0_22 = arith.constant 0 : index
    %34 = vector.load %arg7[%c0_21, %c0_22] : memref<1x32xf32, #tpu.memory_space<vmem>>, vector<1x32xf32>
    %35 = vector.broadcast %34 : vector<1x32xf32> to vector<16x32xf32>
    %36 = arith.addf %33, %35 : vector<16x32xf32>
    %37 = arith.addf %11, %36 : vector<16x32xf32>
    %cst_23 = arith.constant dense<0.000000e+00> : vector<16xf32>
    %38 = vector.multi_reduction <add>, %37, %cst_23 [1] : vector<16x32xf32> to vector<16xf32>
    %39 = vector.shape_cast %38 : vector<16xf32> to vector<16x1xf32>
    %cst_24 = arith.constant 3.200000e+01 : f32
    %40 = vector.broadcast %cst_24 : f32 to vector<16x1xf32>
    %41 = arith.divf %39, %40 : vector<16x1xf32>
    %42 = vector.broadcast %41 : vector<16x1xf32> to vector<16x32xf32>
    %43 = arith.subf %37, %42 : vector<16x32xf32>
    %44 = arith.mulf %43, %43 : vector<16x32xf32>
    %cst_25 = arith.constant dense<0.000000e+00> : vector<16xf32>
    %45 = vector.multi_reduction <add>, %44, %cst_25 [1] : vector<16x32xf32> to vector<16xf32>
    %46 = vector.shape_cast %45 : vector<16xf32> to vector<16x1xf32>
    %cst_26 = arith.constant 3.200000e+01 : f32
    %47 = vector.broadcast %cst_26 : f32 to vector<16x1xf32>
    %48 = arith.divf %46, %47 : vector<16x1xf32>
    %49 = vector.broadcast %41 : vector<16x1xf32> to vector<16x32xf32>
    %50 = arith.subf %37, %49 : vector<16x32xf32>
    %cst_27 = arith.constant 9.99999974E-6 : f32
    %51 = vector.broadcast %cst_27 : f32 to vector<16x1xf32>
    %52 = arith.addf %48, %51 : vector<16x1xf32>
    %53 = math.rsqrt %52 : vector<16x1xf32>
    %54 = vector.broadcast %53 : vector<16x1xf32> to vector<16x32xf32>
    %55 = arith.mulf %50, %54 : vector<16x32xf32>
    %56 = arith.truncf %55 : vector<16x32xf32> to vector<16x32xbf16>
    %c0_28 = arith.constant 0 : index
    %c0_29 = arith.constant 0 : index
    %57 = vector.load %arg8[%c0_28, %c0_29] : memref<32x128xbf16, #tpu.memory_space<vmem>>, vector<32x128xbf16>
    %cst_30 = arith.constant dense<0.000000e+00> : vector<16x128xf32>
    %58 = tpu.matmul %56, %57, %cst_30 {dimension_numbers = #tpu.dot_dimension_numbers<[1], [0], [0], [1], [0, 0, 1, 1], [], []>} : vector<16x32xbf16>, vector<32x128xbf16>, vector<16x128xf32> -> vector<16x128xf32>
    %c0_31 = arith.constant 0 : index
    %c0_32 = arith.constant 0 : index
    %59 = vector.load %arg9[%c0_31, %c0_32] : memref<1x128xf32, #tpu.memory_space<vmem>>, vector<1x128xf32>
    %60 = vector.broadcast %59 : vector<1x128xf32> to vector<16x128xf32>
    %61 = arith.addf %58, %60 : vector<16x128xf32>
    %c0_33 = arith.constant 0 : index
    %c0_34 = arith.constant 0 : index
    %62 = vector.load %arg16[%c0_33, %c0_34] : memref<16x128xf32, #tpu.memory_space<vmem>>, vector<16x128xf32>
    tpu.vector_store %arg16[%c0_33, %c0_34], %61 {strides = array<i32>} : memref<16x128xf32, #tpu.memory_space<vmem>>, vector<16x128xf32>,
    %cst_35 = arith.constant 0.000000e+00 : f32
    %63 = vector.broadcast %cst_35 : f32 to vector<16x64xf32>
    %64 = tpu.concatenate %11, %55, %63 in 1 : vector<16x32xf32>, vector<16x32xf32>, vector<16x64xf32> -> vector<16x128xf32>
    %c0_36 = arith.constant 0 : index
    %c0_37 = arith.constant 0 : index
    %65 = vector.load %arg15[%c0_36, %c0_37] : memref<16x128xf32, #tpu.memory_space<vmem>>, vector<16x128xf32>
    tpu.vector_store %arg15[%c0_36, %c0_37], %64 {strides = array<i32>} : memref<16x128xf32, #tpu.memory_space<vmem>>, vector<16x128xf32>,
    %66 = arith.truncf %55 : vector<16x32xf32> to vector<16x32xbf16>
    %c0_38 = arith.constant 0 : index
    %c0_39 = arith.constant 0 : index
    %67 = vector.load %arg10[%c0_38, %c0_39] : memref<32x32xbf16, #tpu.memory_space<vmem>>, vector<32x32xbf16>
    %cst_40 = arith.constant dense<0.000000e+00> : vector<16x32xf32>
    %68 = tpu.matmul %66, %67, %cst_40 {dimension_numbers = #tpu.dot_dimension_numbers<[1], [0], [0], [1], [0, 0, 1, 1], [], []>} : vector<16x32xbf16>, vector<32x32xbf16>, vector<16x32xf32> -> vector<16x32xf32>
    %69 = vector.shape_cast %0 : vector<16x8x16xf32> to vector<128x16xf32>
    %70 = arith.truncf %69 : vector<128x16xf32> to vector<128x16xbf16>
    %c0_41 = arith.constant 0 : index
    %c0_42 = arith.constant 0 : index
    %71 = vector.load %arg11[%c0_41, %c0_42] : memref<16x32xbf16, #tpu.memory_space<vmem>>, vector<16x32xbf16>
    %cst_43 = arith.constant dense<0.000000e+00> : vector<128x32xf32>
    %72 = tpu.matmul %70, %71, %cst_43 {dimension_numbers = #tpu.dot_dimension_numbers<[1], [0], [0], [1], [0, 0, 1, 1], [], []>} : vector<128x16xbf16>, vector<16x32xbf16>, vector<128x32xf32> -> vector<128x32xf32>
    %73 = vector.shape_cast %72 : vector<128x32xf32> to vector<16x8x32xf32>
    %74 = vector.shape_cast %68 : vector<16x32xf32> to vector<16x1x32xf32>
    %75 = vector.broadcast %74 : vector<16x1x32xf32> to vector<16x8x32xf32>
    %76 = arith.addf %73, %75 : vector<16x8x32xf32>
    %c0_44 = arith.constant 0 : index
    %c0_45 = arith.constant 0 : index
    %77 = vector.load %arg12[%c0_44, %c0_45] : memref<1x32xf32, #tpu.memory_space<vmem>>, vector<1x32xf32>
    %78 = vector.shape_cast %77 : vector<1x32xf32> to vector<1x1x32xf32>
    %79 = vector.broadcast %78 : vector<1x1x32xf32> to vector<16x8x32xf32>
    %80 = arith.addf %76, %79 : vector<16x8x32xf32>
    %81 = arith.mulf %80, %80 : vector<16x8x32xf32>
    %82 = arith.mulf %80, %81 : vector<16x8x32xf32>
    %cst_46 = arith.constant 4.471500e-02 : f32
    %83 = vector.broadcast %cst_46 : f32 to vector<16x8x32xf32>
    %84 = arith.mulf %83, %82 : vector<16x8x32xf32>
    %85 = arith.addf %80, %84 : vector<16x8x32xf32>
    %cst_47 = arith.constant 0.797884583 : f32
    %86 = vector.broadcast %cst_47 : f32 to vector<16x8x32xf32>
    %87 = arith.mulf %86, %85 : vector<16x8x32xf32>
    %88 = math.tanh %87 : vector<16x8x32xf32>
    %cst_48 = arith.constant 1.000000e+00 : f32
    %89 = vector.broadcast %cst_48 : f32 to vector<16x8x32xf32>
    %90 = arith.addf %89, %88 : vector<16x8x32xf32>
    %cst_49 = arith.constant 5.000000e-01 : f32
    %91 = vector.broadcast %cst_49 : f32 to vector<16x8x32xf32>
    %92 = arith.mulf %91, %90 : vector<16x8x32xf32>
    %93 = arith.mulf %80, %92 : vector<16x8x32xf32>
    %94 = vector.shape_cast %93 : vector<16x8x32xf32> to vector<128x32xf32>
    %95 = arith.truncf %94 : vector<128x32xf32> to vector<128x32xbf16>
    %c0_50 = arith.constant 0 : index
    %c0_51 = arith.constant 0 : index
    %96 = vector.load %arg13[%c0_50, %c0_51] : memref<32x128xbf16, #tpu.memory_space<vmem>>, vector<32x128xbf16>
    %cst_52 = arith.constant dense<0.000000e+00> : vector<128x128xf32>
    %97 = tpu.matmul %95, %96, %cst_52 {dimension_numbers = #tpu.dot_dimension_numbers<[1], [0], [0], [1], [0, 0, 1, 1], [], []>} : vector<128x32xbf16>, vector<32x128xbf16>, vector<128x128xf32> -> vector<128x128xf32>
    %c0_53 = arith.constant 0 : index
    %c0_54 = arith.constant 0 : index
    %98 = vector.load %arg14[%c0_53, %c0_54] : memref<1x128xf32, #tpu.memory_space<vmem>>, vector<1x128xf32>
    %99 = vector.broadcast %98 : vector<1x128xf32> to vector<128x128xf32>
    %100 = arith.addf %97, %99 : vector<128x128xf32>
    %101 = vector.shape_cast %100 : vector<128x128xf32> to vector<16x8x128xf32>
    %c0_55 = arith.constant 0 : index
    %c0_56 = arith.constant 0 : index
    %c0_57 = arith.constant 0 : index
    %102 = vector.load %arg17[%c0_55, %c0_56, %c0_57] : memref<16x8x128xf32, #tpu.memory_space<vmem>>, vector<16x8x128xf32>
    tpu.vector_store %arg17[%c0_55, %c0_56, %c0_57], %101 {strides = array<i32>} : memref<16x8x128xf32, #tpu.memory_space<vmem>>, vector<16x8x128xf32>,
    return
  }
}

</mosaic_0001>

<bundles_post_ra>
// kernel: tpu_custom_call.1
= control target key start
LH: loop header
LB: loop body
LE: loop exit
PB: predicated region body
PF: predicated region fallthrough
CT: control target
= control target key end

     0   :  { %s2497_s0 = inlined_call_operand.hbm [shape: f32[16,8,16], index: 0, kind: input, shape index: {}]   ;;  %s2498_s1 = inlined_call_operand.vmem [shape: f32[16,1], index: 1, kind: input, shape index: {}]   ;;  %s2499_s2 = inlined_call_operand.hbm [shape: bf16[16,32], index: 2, kind: input, shape index: {}]   ;;  %s2500_s3 = inlined_call_operand.hbm [shape: f32[1,32], index: 3, kind: input, shape index: {}]   ;;  %s2501_s4 = inlined_call_operand.vmem [shape: bf16[32,64], index: 4, kind: input, shape index: {}]   ;;  %s2502_s5 = inlined_call_operand.vmem [shape: f32[1,64], index: 5, kind: input, shape index: {}]   ;;  %s2503_s6 = inlined_call_operand.vmem [shape: bf16[64,32], index: 6, kind: input, shape index: {}]   ;;  %s2504_s7 = inlined_call_operand.vmem [shape: f32[1,32], index: 7, kind: input, shape index: {}]   ;;  %s2505_s8 = inlined_call_operand.vmem [shape: bf16[32,128], index: 8, kind: input, shape index: {}]   ;;  %s2506_s9 = inlined_call_operand.vmem [shape: f32[1,128], index: 9, kind: input, shape index: {}]   ;;  %s2507_s10 = inlined_call_operand.vmem [shape: bf16[32,32], index: 10, kind: input, shape index: {}]   ;;  %s2508_s11 = inlined_call_operand.vmem [shape: bf16[16,32], index: 11, kind: input, shape index: {}]   ;;  %s2509_s12 = inlined_call_operand.vmem [shape: f32[1,32], index: 12, kind: input, shape index: {}]   ;;  %s2510_s13 = inlined_call_operand.vmem [shape: bf16[32,128], index: 13, kind: input, shape index: {}]   ;;  %s2511_s14 = inlined_call_operand.vmem [shape: f32[1,128], index: 14, kind: input, shape index: {}]   ;;  %s2512_s15 = inlined_call_operand.hbm [shape: f32[16,128], index: 15, kind: output, shape index: {0}]   ;;  %s2513_s16 = inlined_call_operand.hbm [shape: f32[16,128], index: 16, kind: output, shape index: {1}]   ;;  %s2514_s17 = inlined_call_operand.hbm [shape: f32[16,8,128], index: 17, kind: output, shape index: {2}]  }
   0x1   :  { %2523 = sst [smem:[#allocation19_spill]] %s2497_s0 }
   0x2   :  { %2524 = sst [smem:[#allocation20_spill]] %s2498_s1 }
   0x3   :  { %2525 = sst [smem:[#allocation21_spill]] %s2514_s17 }
   0x4   :  { %23 = vsyncpa [#allocation3], 0 }
   0x5   :  { %24 = vsyncpa [#allocation6], 0 }
   0x6   :  { %25 = vsyncpa [#allocation4], 0 }
   0x7   :  { %26 = vsyncpa [#allocation10], 0  ;;  %s1854_s24 = smov [#allocation5]   ;;  %s1714_s28 = scalar_lea.hbm %s2499_s2, 128 }
   0x8   :  { %s46_s25 = sshll.u32 %s1854_s24, 4  ;;  %p1715_p0 = scmp.ne.s32.totalorder %s2499_s2, %s1714_s28  ;;  %s47_s25 = int_to_ptr.vmem [resolvable:$true] %s46_s25 }
   0x9   :  { %p1718_p1 = scmp.lt.u32.totalorder %s1714_s28, %s2499_s2 }
   0xb   :  { %p1720_p2 = pnand %p1718_p1, %p1715_p0 }
   0xd   :  { %1723 = shalt.err (!%p1720_p2)
}
   0xe   :  { %s1724_s19 = scalar_lea.vmem %s47_s25, 128  ;;  %p1729_p4 = scmp.lt.s32.totalorder %s47_s25, %s47_s25 }
   0xf   :  { %p1725_p3 = scmp.ne.s32.totalorder %s47_s25, %s1724_s19  ;;  %p1730_p5 = scmp.lt.s32.totalorder %s1724_s19, %s1724_s19 }
  0x11   :  { %p1731_p6 = por %p1730_p5, %p1729_p4 }
  0x13   :  { %p1732_p7 = pnand %p1731_p6, %p1725_p3 }
  0x15   :  { %1735 = shalt.err (!%p1732_p7)
}
  0x16   :  { %s1855_s1 = smov 64   ;;  %s1856_s20 = smov 4  }
  0x17   :  { %52 = dma.hbm_to_vmem [thread:$0]  %s2499_s2, 128, %s47_s25, [#allocation6], %s1855_s1, %s1855_s1, %s1856_s20  }
  0x18   :  { %s1857_s23 = smov [#allocation2]   ;;  %s2526_s28 = sld [smem:[#allocation19_spill]] }
  0x19   :  { %s32_s24 = sshll.u32 %s1857_s23, 4  ;;  %s33_s24 = int_to_ptr.vmem [resolvable:$true] %s32_s24 }
  0x1e   :  { %s1736_s29 = scalar_lea.hbm %s2526_s28, 2048 }
  0x1f   :  { %p1737_p8 = scmp.ne.s32.totalorder %s2526_s28, %s1736_s29  ;;  %p1740_p9 = scmp.lt.u32.totalorder %s1736_s29, %s2526_s28 }
  0x21   :  { %p1742_p10 = pnand %p1740_p9, %p1737_p8 }
  0x23   :  { %1745 = shalt.err (!%p1742_p10)
}
  0x24   :  { %s1746_s17 = scalar_lea.vmem %s33_s24, 2048  ;;  %p1751_p12 = scmp.lt.s32.totalorder %s33_s24, %s33_s24 }
  0x25   :  { %p1747_p11 = scmp.ne.s32.totalorder %s33_s24, %s1746_s17  ;;  %p1752_p13 = scmp.lt.s32.totalorder %s1746_s17, %s1746_s17 }
  0x27   :  { %p1753_p0 = por %p1752_p13, %p1751_p12 }
  0x29   :  { %p1754_p1 = pnand %p1753_p0, %p1747_p11 }
  0x2b   :  { %1757 = shalt.err (!%p1754_p1)
}
  0x2c   :  { %s1858_s2 = smov 128   ;;  %s1859_s25 = smov 8  }
  0x2d   :  { %38 = dma.hbm_to_vmem [thread:$0]  %s2526_s28, 2048, %s33_s24, [#allocation3], %s1858_s2, %s1858_s2, %s1859_s25  }
  0x2e   :  { %s1860_s21 = smov [#allocation7]   ;;  %s1758_s27 = scalar_lea.hbm %s2500_s3, 16 }
  0x2f   :  { %s59_s22 = sshll.u32 %s1860_s21, 4  ;;  %p1759_p2 = scmp.ne.s32.totalorder %s2500_s3, %s1758_s27  ;;  %s60_s22 = int_to_ptr.vmem [resolvable:$true] %s59_s22 }
  0x30   :  { %p1762_p3 = scmp.lt.u32.totalorder %s1758_s27, %s2500_s3 }
  0x32   :  { %p1764_p4 = pnand %p1762_p3, %p1759_p2 }
  0x34   :  { %1767 = shalt.err (!%p1764_p4)
}
  0x35   :  { %s1768_s18 = scalar_lea.vmem %s60_s22, 16  ;;  %s1772_s24 = scalar_lea.vmem %s60_s22, 32 }
  0x36   :  { %p1769_p5 = scmp.ne.s32.totalorder %s60_s22, %s1768_s18  ;;  %p1773_p6 = scmp.lt.s32.totalorder %s60_s22, %s60_s22 }
  0x37   :  { %p1774_p7 = scmp.lt.s32.totalorder %s1772_s24, %s1768_s18 }
  0x39   :  { %p1775_p8 = por %p1774_p7, %p1773_p6 }
  0x3b   :  { %p1776_p9 = pnand %p1775_p8, %p1769_p5 }
  0x3d   :  { %1779 = shalt.err (!%p1776_p9)
}
  0x3e   :  { %62 = dma.hbm_to_vmem [thread:$0]  %s2500_s3, 16, %s60_s22, [#allocation6]  }
  0x3f   :  { %1846 = dma.done.wait [#allocation3], 2048  }
  0x40   :  { %1847 = vsyncadd [#allocation3], 4294965248 }
  0x41   :  { %1848 = dma.done.wait [#allocation6], 144  }
  0x42   :  { %1849 = vsyncadd [#allocation6], 4294967152  ;;  %v1861_v0 = vmov 0   ;;  %s2527_s21 = sld [smem:[#allocation20_spill]]  ;;  %v1656_v5 = vld [vmem:[#allocation5] sm:$0xff]   ;;  %v2518_v6 = vmov 0.0  }
  0x43   :  { %1655 = vset.pattern.permute.xlu0 %v1861_v0  ;;  %1560 = vmatprep.subr.bf16.mxu0 %v2518_v6  ;;  %vm1863_vm0 = vmmov 0   ;;  %vm111_vm1 = vcmask 130048   ;;  %v2011_v7 = vld [vmem:[#allocation2] sm:$0xff]  ;;  %v2013_v8 = vld [vmem:[#allocation2 + $0x8] sm:$0xff]  ;;  %v2015_v9 = vld [vmem:[#allocation2 + $0x10] sm:$0xff]  ;;  %vm340_vm2 = vcmask 1041409  }
  0x44   :  { %1562 = vmatprep.mubr.msk.bf16.mxu0 %vm1863_vm0, %v2518_v6  ;;  %1561 = vmatpush3.bf16.msra.mxu0 %v1656_v5  ;;  %v2017_v10 = vld [vmem:[#allocation2 + $0x18] sm:$0xff]  ;;  %v112_v11 = vsel %vm111_vm1, %v2011_v7, 0.0  ;;  %v119_v12 = vsel %vm111_vm1, %v2013_v8, 0.0  ;;  %v2023_v13 = vld [vmem:[#allocation2 + $0x40] sm:$0xff]  ;;  %v2025_v14 = vld [vmem:[#allocation2 + $0x48] sm:$0xff]  ;;  %v126_v17 = vsel %vm111_vm1, %v2015_v9, 0.0 }
  0x45   :  { %1566 = vmatprep.subr.bf16.mxu1 %v2518_v6  ;;  %1570 = vmatprep.mubr.msk.bf16.mxu1 %vm1863_vm0, %v2518_v6  ;;  %v2027_v15 = vld [vmem:[#allocation2 + $0x50] sm:$0xff]  ;;  %v2029_v16 = vld [vmem:[#allocation2 + $0x58] sm:$0xff]  ;;  %v2033_v18 = vld [vmem:[#allocation2 + $0x20] sm:$0xff]  ;;  %v113_v21 = vrot.slane %v112_v11, 4  ;;  %v120_v22 = vrot.slane %v119_v12, 4  ;;  %v133_v23 = vsel %vm111_vm1, %v2017_v10, 0.0 }
  0x46   :  { %1574 = vmatprep.subr.bf16.mxu0 %v2518_v6  ;;  %v2035_v19 = vld [vmem:[#allocation2 + $0x28] sm:$0xff]  ;;  %v2037_v20 = vld [vmem:[#allocation2 + $0x30] sm:$0xff]  ;;  %v2041_v24 = vld [vmem:[#allocation2 + $0x38] sm:$0xff]  ;;  %v168_v27 = vsel %vm111_vm1, %v2023_v13, 0.0  ;;  %v175_v28 = vsel %vm111_vm1, %v2025_v14, 0.0  ;;  %v182_v29 = vsel %vm111_vm1, %v2027_v15, 0.0 }
  0x47   :  { %v2043_v25 = vld [vmem:[#allocation2 + $0x60] sm:$0xff]  ;;  %v2045_v26 = vld [vmem:[#allocation2 + $0x68] sm:$0xff]  ;;  %v189_v30 = vsel %vm111_vm1, %v2029_v16, 0.0  ;;  %v127_v31 = vrot.slane %v126_v17, 4  ;;  %v140_v32 = vsel %vm111_vm1, %v2033_v18, 0.0  ;;  %v147_v33 = vsel %vm111_vm1, %v2035_v19, 0.0 }
  0x48   :  { %v224_v1 = vld [vmem:[%s2527_s21] sm:$0xff]  ;;  %v225_v2 = vld [vmem:[%s2527_s21 + $0x8] sm:$0xff]  ;;  %2528 = vst [vmem:[#allocation16_spill] sm:$0xff] %v2045_v26  ;;  %v154_v34 = vsel %vm111_vm1, %v2037_v20, 0.0  ;;  %v134_v35 = vrot.slane %v133_v23, 4  ;;  %v2061_v36 = vld [vmem:[#allocation2 + $0x70] sm:$0xff]  ;;  %v114_v45 = vadd.f32 %v113_v21, %v112_v11  ;;  %v121_v53 = vadd.f32 %v120_v22, %v119_v12 }
  0x49   :  { %1670 = vrcp.f32 %v224_v1  ;;  %2529 = vst [vmem:[#allocation17_spill] sm:$0xff] %v2061_v36  ;;  %v161_v37 = vsel %vm111_vm1, %v2041_v24, 0.0  ;;  %v196_v38 = vsel %vm111_vm1, %v2043_v25, 0.0  ;;  %v203_v39 = vsel %vm111_vm1, %v2045_v26, 0.0  ;;  %v2069_v44 = vld [vmem:[#allocation2 + $0x78] sm:$0xff]  ;;  %s1867_s19 = smov [#allocation8]  }
  0x4a   :  { %1672 = vrcp.f32 %v225_v2  ;;  %v169_v40 = vrot.slane %v168_v27, 4  ;;  %v176_v41 = vrot.slane %v175_v28, 4  ;;  %v183_v42 = vrot.slane %v182_v29, 4  ;;  %2530 = vst [vmem:[#allocation18_spill] sm:$0xff] %v2069_v44  ;;  %s1440_s1 = sshll.u32 %s1867_s19, 4  ;;  %s1441_s1 = int_to_ptr.vmem [resolvable:$true] %s1440_s1 }
  0x4b   :  { %v190_v43 = vrot.slane %v189_v30, 4  ;;  %v141_v46 = vrot.slane %v140_v32, 4  ;;  %v148_v47 = vrot.slane %v147_v33, 4  ;;  %v155_v48 = vrot.slane %v154_v34, 4 }
  0x4c   :  { %v162_v49 = vrot.slane %v161_v37, 4  ;;  %v197_v50 = vrot.slane %v196_v38, 4  ;;  %v204_v51 = vrot.slane %v203_v39, 4  ;;  %v210_v52 = vsel %vm111_vm1, %v2061_v36, 0.0 }
  0x4d   :  { %v128_v54 = vadd.f32 %v127_v31, %v126_v17  ;;  %v135_v55 = vadd.f32 %v134_v35, %v133_v23  ;;  %v217_v56 = vsel %vm111_vm1, %v2069_v44, 0.0  ;;  %v170_v57 = vadd.f32 %v169_v40, %v168_v27 }
  0x4e   :  { %v177_v58 = vadd.f32 %v176_v41, %v175_v28  ;;  %v184_v59 = vadd.f32 %v183_v42, %v182_v29  ;;  %v191_v60 = vadd.f32 %v190_v43, %v189_v30  ;;  %v142_v61 = vadd.f32 %v141_v46, %v140_v32 }
  0x4f   :  { %v149_v62 = vadd.f32 %v148_v47, %v147_v33  ;;  %v156_v63 = vadd.f32 %v155_v48, %v154_v34  ;;  %v211_v0 = vrot.slane %v210_v52, 4  ;;  %v163_v1 = vadd.f32 %v162_v49, %v161_v37 }
  0x50   :  { %v198_v2 = vadd.f32 %v197_v50, %v196_v38  ;;  %v115_v5 = vrot.slane %v114_v45, 2  ;;  %v122_v11 = vrot.slane %v121_v53, 2  ;;  %v129_v12 = vrot.slane %v128_v54, 2 }
  0x51   :  { %v136_v17 = vrot.slane %v135_v55, 2  ;;  %v171_v21 = vrot.slane %v170_v57, 2  ;;  %v178_v22 = vrot.slane %v177_v58, 2  ;;  %v185_v23 = vrot.slane %v184_v59, 2 }
  0x52   :  { %v192_v31 = vrot.slane %v191_v60, 2  ;;  %v143_v27 = vrot.slane %v142_v61, 2  ;;  %v150_v28 = vrot.slane %v149_v62, 2  ;;  %v157_v29 = vrot.slane %v156_v63, 2 }
  0x53   :  { %v1671_v3 = vpop.eup %1670  ;;  %v212_v30 = vadd.f32 %v211_v0, %v210_v52  ;;  %v164_v32 = vrot.slane %v163_v1, 2  ;;  %v199_v33 = vrot.slane %v198_v2, 2  ;;  %v116_v37 = vadd.f32 %v115_v5, %v114_v45 }
  0x54   :  { %230 = vperm.xlu0 %1655, %v1671_v3   ;;  %v1673_v4 = vpop.eup %1672  ;;  %v205_v3 = vadd.f32 %v204_v51, %v203_v39  ;;  %v123_v38 = vadd.f32 %v122_v11, %v121_v53  ;;  %v130_v39 = vadd.f32 %v129_v12, %v128_v54  ;;  %v137_v40 = vadd.f32 %v136_v17, %v135_v55 }
  0x55   :  { %v172_v41 = vadd.f32 %v171_v21, %v170_v57  ;;  %v179_v42 = vadd.f32 %v178_v22, %v177_v58  ;;  %v186_v43 = vadd.f32 %v185_v23, %v184_v59  ;;  %v193_v46 = vadd.f32 %v192_v31, %v191_v60 }
  0x56   :  { %v206_v34 = vrot.slane %v205_v3, 2  ;;  %v144_v47 = vadd.f32 %v143_v27, %v142_v61  ;;  %v151_v48 = vadd.f32 %v150_v28, %v149_v62  ;;  %v158_v49 = vadd.f32 %v157_v29, %v156_v63 }
  0x57   :  { %v213_v50 = vrot.slane %v212_v30, 2  ;;  %v165_v51 = vadd.f32 %v164_v32, %v163_v1  ;;  %v200_v6 = vadd.f32 %v199_v33, %v198_v2  ;;  %v117_v0 = vrot.slane %v116_v37, 1 }
  0x58   :  { %234 = vperm.xlu0 %1655, %v1673_v4   ;;  %v218_v4 = vrot.slane %v217_v56, 4  ;;  %v207_v44 = vadd.f32 %v206_v34, %v205_v3  ;;  %v124_v36 = vrot.slane %v123_v38, 1  ;;  %v131_v26 = vrot.slane %v130_v39, 1 }
  0x59   :  { %v173_v45 = vrot.slane %v172_v41, 1  ;;  %v180_v53 = vrot.slane %v179_v42, 1  ;;  %v187_v54 = vrot.slane %v186_v43, 1  ;;  %v194_v55 = vrot.slane %v193_v46, 1 }
  0x5a   :  { %v219_v35 = vadd.f32 %v218_v4, %v217_v56  ;;  %v138_v56 = vrot.slane %v137_v40, 1  ;;  %v145_v57 = vrot.slane %v144_v47, 1  ;;  %v152_v58 = vrot.slane %v151_v48, 1 }
  0x5b   :  { %v159_v59 = vrot.slane %v158_v49, 1  ;;  %v214_v60 = vadd.f32 %v213_v50, %v212_v30  ;;  %v166_v61 = vrot.slane %v165_v51, 1  ;;  %v201_v62 = vrot.slane %v200_v6, 1 }
  0x5c   :  { %v220_v52 = vrot.slane %v219_v35, 2  ;;  %v208_v63 = vrot.slane %v207_v44, 1  ;;  %v118_v1 = vadd.f32 %v117_v0, %v116_v37  ;;  %v125_v2 = vadd.f32 %v124_v36, %v123_v38 }
  0x5d   :  { %v132_v3 = vadd.f32 %v131_v26, %v130_v39  ;;  %v139_v5 = vadd.f32 %v138_v56, %v137_v40  ;;  %v174_v11 = vadd.f32 %v173_v45, %v172_v41  ;;  %v181_v12 = vadd.f32 %v180_v53, %v179_v42 }
  0x5e   :  { %v221_v4 = vadd.f32 %v220_v52, %v219_v35  ;;  %v188_v17 = vadd.f32 %v187_v54, %v186_v43  ;;  %v195_v21 = vadd.f32 %v194_v55, %v193_v46  ;;  %v146_v22 = vadd.f32 %v145_v57, %v144_v47 }
  0x5f   :  { %v153_v23 = vadd.f32 %v152_v58, %v151_v48  ;;  %v160_v31 = vadd.f32 %v159_v59, %v158_v49  ;;  %v215_v27 = vrot.slane %v214_v60, 1  ;;  %v167_v29 = vadd.f32 %v166_v61, %v165_v51 }
  0x60   :  { %v202_v32 = vadd.f32 %v201_v62, %v200_v6  ;;  %v209_v30 = vadd.f32 %v208_v63, %v207_v44  ;;  %v222_v33 = vrot.slane %v221_v4, 1  ;;  %vm343_vm3 = vcmask 1042434  }
  0x61   :  { %v216_v43 = vadd.f32 %v215_v27, %v214_v60  ;;  %vm346_vm4 = vcmask 1043459   ;;  %vm349_vm5 = vcmask 1044484   ;;  %vm352_vm6 = vcmask 1045509  }
  0x62   :  { %v223_v48 = vadd.f32 %v222_v33, %v221_v4  ;;  %vm355_vm7 = vcmask 1046534   ;;  %vm358_vm8 = vcmask 1047559   ;;  %vm449_vm9 = vcmask 261120  }
  0x63   :  { %vm552_vm10 = vcmask 523264  }
  0xd3   :  { %v231_v28 = vpop.permute.xlu0 %230 }
  0xd4   :  { %v236_v34 = vrot.slane %v231_v28, 1  ;;  %v237_v50 = vrot.slane %v231_v28, 2  ;;  %v238_v35 = vrot.slane %v231_v28, 3  ;;  %v239_v37 = vrot.slane %v231_v28, 4 }
  0xd5   :  { %v240_v36 = vrot.slane %v231_v28, 5  ;;  %v266_v26 = vmul.f32 %v231_v28, %v118_v1  ;;  %v241_v38 = vrot.slane %v231_v28, 6  ;;  %v242_v39 = vrot.slane %v231_v28, 7 }
  0xd6   :  { %v267_v40 = vmul.f32 %v236_v34, %v125_v2  ;;  %v268_v41 = vmul.f32 %v237_v50, %v132_v3  ;;  %v269_v42 = vmul.f32 %v238_v35, %v139_v5  ;;  %v270_v49 = vmul.f32 %v239_v37, %v146_v22 }
  0xd7   :  { %v282_v46 = vpack.c.bf16 %v266_v26, %v266_v26  ;;  %v235_v47 = vpop.permute.xlu0 %234  ;;  %v271_v51 = vmul.f32 %v240_v36, %v153_v23  ;;  %v272_v0 = vmul.f32 %v241_v38, %v160_v31  ;;  %v273_v54 = vmul.f32 %v242_v39, %v167_v29 }
  0xd8   :  { %v283_v6 = vpack.c.bf16 %v267_v40, %v267_v40  ;;  %v284_v44 = vpack.c.bf16 %v268_v41, %v268_v41  ;;  %v243_v52 = vrot.slane %v235_v47, 1  ;;  %v244_v56 = vrot.slane %v235_v47, 2 }
  0xd9   :  { %v245_v45 = vrot.slane %v235_v47, 3  ;;  %v246_v53 = vrot.slane %v235_v47, 4  ;;  %v285_v55 = vpack.c.bf16 %v269_v42, %v269_v42  ;;  %v247_v58 = vrot.slane %v235_v47, 5 }
  0xda   :  { %v324_v57 = vunpack.c.l.b16 %v283_v6  ;;  %v274_v59 = vmul.f32 %v235_v47, %v174_v11  ;;  %v275_v60 = vmul.f32 %v243_v52, %v181_v12  ;;  %v276_v61 = vmul.f32 %v244_v56, %v188_v17 }
  0xdb   :  { %v277_v62 = vmul.f32 %v245_v45, %v195_v21  ;;  %v248_v63 = vrot.slane %v235_v47, 6  ;;  %v323_v4 = vunpack.c.l.b16 %v282_v46  ;;  %v325_v1 = vunpack.c.l.b16 %v284_v44 }
  0xdc   :  { %v339_v2 = vrot.slane %v324_v57, 7  ;;  %v249_v3 = vrot.slane %v235_v47, 7  ;;  %v290_v5 = vpack.c.bf16 %v274_v59, %v274_v59  ;;  %v291_v22 = vpack.c.bf16 %v275_v60, %v275_v60 }
  0xdd   :  { %v292_v23 = vpack.c.bf16 %v276_v61, %v276_v61  ;;  %v278_v31 = vmul.f32 %v246_v53, %v202_v32  ;;  %v293_v27 = vpack.c.bf16 %v277_v62, %v277_v62  ;;  %v279_v28 = vmul.f32 %v247_v58, %v209_v30 }
  0xde   :  { %v280_v29 = vmul.f32 %v248_v63, %v216_v43  ;;  %v281_v11 = vmul.f32 %v249_v3, %v223_v48  ;;  %v332_v12 = vunpack.c.l.b16 %v291_v22  ;;  %v286_v21 = vpack.c.bf16 %v270_v49, %v270_v49 }
  0xdf   :  { %v333_v17 = vunpack.c.l.b16 %v292_v23  ;;  %v287_v33 = vpack.c.bf16 %v271_v51, %v271_v51  ;;  %v288_v34 = vpack.c.bf16 %v272_v0, %v272_v0  ;;  %v289_v50 = vpack.c.bf16 %v273_v54, %v273_v54 }
  0xe0   :  { %v294_v35 = vpack.c.bf16 %v278_v31, %v278_v31  ;;  %v295_v37 = vpack.c.bf16 %v279_v28, %v279_v28  ;;  %v342_v36 = vrot.slane %v325_v1, 6  ;;  %v331_v26 = vunpack.c.l.b16 %v290_v5 }
  0xe1   :  { %v296_v38 = vpack.c.bf16 %v280_v29, %v280_v29  ;;  %v297_v39 = vpack.c.bf16 %v281_v11, %v281_v11  ;;  %v360_v40 = vrot.slane %v332_v12, 7  ;;  %v326_v32 = vunpack.c.l.b16 %v285_v55  ;;  %v1657_v11 = vld [vmem:[%s2501_s4] sm:$0xff]   ;;  %v1658_v12 = vld [vmem:[%s2501_s4 + $0x8] sm:$0xff]  }
  0xe2   :  { %v327_v41 = vunpack.c.l.b16 %v286_v21  ;;  %v328_v42 = vunpack.c.l.b16 %v287_v33  ;;  %v362_v30 = vrot.slane %v333_v17, 6  ;;  %v329_v43 = vunpack.c.l.b16 %v288_v34  ;;  %1567 = vmatpush3.bf16.msra.mxu1 %v1657_v11  ;;  %v1484_v17 = vld [vmem:[#allocation7] ss:$0 sm:$0xff] }
  0xe3   :  { %v334_v46 = vunpack.c.l.b16 %v293_v27  ;;  %v335_v47 = vunpack.c.l.b16 %v294_v35  ;;  %v330_v48 = vunpack.c.l.b16 %v289_v50  ;;  %v336_v6 = vunpack.c.l.b16 %v295_v37 }
  0xe4   :  { %v341_v49 = vsel %vm340_vm2, %v339_v2, %v323_v4  ;;  %v345_v51 = vrot.slane %v326_v32, 5  ;;  %v337_v44 = vunpack.c.l.b16 %v296_v38  ;;  %v338_v52 = vunpack.c.l.b16 %v297_v39  ;;  %v1660_v38 = vld [vmem:[%s2503_s6 + $0x8] sm:$0xff]   ;;  %v1661_v39 = vld [vmem:[%s2503_s6 + $0x10] sm:$0xff]   ;;  %v1487_v32 = vld [vmem:[%s2502_s5] ss:$0 sm:$0xff] }
  0xe5   :  { %v344_v0 = vsel %vm343_vm3, %v342_v36, %v341_v49  ;;  %v348_v56 = vrot.slane %v327_v41, 4  ;;  %v351_v53 = vrot.slane %v328_v42, 3  ;;  %v361_v54 = vsel %vm340_vm2, %v360_v40, %v331_v26  ;;  %v1659_v26 = vld [vmem:[%s2503_s6] sm:$0xff]   ;;  %v1662_v40 = vld [vmem:[%s2503_s6 + $0x18] sm:$0xff]  }
  0xe6   :  { %v347_v45 = vsel %vm346_vm4, %v345_v51, %v344_v0  ;;  %v364_v55 = vrot.slane %v334_v46, 5  ;;  %v354_v58 = vrot.slane %v329_v43, 2  ;;  %v363_v59 = vsel %vm343_vm3, %v362_v30, %v361_v54 }
  0xe7   :  { %v350_v57 = vsel %vm349_vm5, %v348_v56, %v347_v45  ;;  %v366_v60 = vrot.slane %v335_v47, 4  ;;  %v368_v63 = vrot.slane %v336_v6, 3  ;;  %v370_v2 = vrot.slane %v337_v44, 2 }
  0xe8   :  { %v353_v61 = vsel %vm352_vm6, %v351_v53, %v350_v57  ;;  %v365_v62 = vsel %vm346_vm4, %v364_v55, %v363_v59  ;;  %v357_v3 = vrot.slane %v330_v48, 1  ;;  %v372_v22 = vrot.slane %v338_v52, 1 }
  0xe9   :  { %v356_v4 = vsel %vm355_vm7, %v354_v58, %v353_v61  ;;  %v367_v1 = vsel %vm349_vm5, %v366_v60, %v365_v62  ;;  %v2531_v29 = vmov 0.0  }
  0xea   :  { %v369_v5 = vsel %vm352_vm6, %v368_v63, %v367_v1  ;;  %v359_v31 = vsel %vm358_vm8, %v357_v3, %v356_v4  ;;  %1568 = vmatprep.subr.bf16.mxu1 %v2531_v29  ;;  %v1491_v4 = vld [vmem:[%s2504_s7] ss:$0 sm:$0xff] }
  0xeb   :  { %v371_v23 = vsel %vm355_vm7, %v370_v2, %v369_v5  ;;  %1569 = vmatpush3.bf16.msra.mxu1 %v1658_v12 }
  0xec   :  { %v373_v27 = vsel %vm358_vm8, %v372_v22, %v371_v23  ;;  %1586 = vmatprep.subr.bf16.mxu1 %v2531_v29 }
  0xed   :  { %v374_v28 = vpack.c.b16 %v373_v27, %v359_v31 }
  0xef   :  { %1563 = vmatmul.mubr.msk.bf16.vlgmr.msra.gmra.mrb[0].mxu0 %vm111_vm1, %v374_v28 }
  0xf0   :  { %1582 = vmatprep.mubr.msk.bf16.mxu0 %vm1863_vm0, %v2531_v29  ;;  %1575 = vmatpush3.bf16.msra.mxu0 %v1659_v26 }
  0xf1   :  { %1576 = vmatprep.subr.bf16.mxu0 %v2531_v29 }
  0xf4   :  { %1577 = vmatpush3.bf16.msra.mxu0 %v1660_v38 }
  0xf5   :  { %1578 = vmatprep.subr.bf16.mxu0 %v2531_v29 }
  0xf8   :  { %1579 = vmatpush3.bf16.msra.mxu0 %v1661_v39 }
  0xf9   :  { %1580 = vmatprep.subr.bf16.mxu0 %v2531_v29 }
  0xfc   :  { %1581 = vmatpush3.bf16.msra.mxu0 %v1662_v40  ;;  %v1663_v40 = vld [vmem:[%s2508_s11] sm:$0xff]  }
  0xfd   :  { %1602 = vmatprep.subr.bf16.mxu0 %v1663_v40 }
 0x1c2   :  { %v418_v21 = vpop.f32.mrb[0].mxu0 }
 0x1c3   :  { %v1564_v33 = vpop.f32.mrb[1].mxu0  ;;  %v2098_v50 = vadd.f32 %v1484_v17, %v418_v21 }
 0x1c4   :  { %v421_v34 = vpop.f32.mrb[2].mxu0 }
 0x1c5   :  { %v2100_v35 = vadd.f32 %v1484_v17, %v421_v34  ;;  %v1565_v37 = vpop.f32.mrb[3].mxu0 }
 0x1c7   :  { %v425_v36 = vpack.c.bf16 %v2100_v35, %v2098_v50 }
 0x1c9   :  { %1571 = vmatmul.mubr.msk.bf16.vlgmr.msra.gmra.mrb[0].mxu1 %vm449_vm9, %v425_v36 }
 0x1ca   :  { %1590 = vmatprep.mubr.msk.bf16.mxu1 %vm1863_vm0, %v2531_v29 }
 0x29c   :  { %v487_v41 = vpop.f32.mrb[0].mxu1 }
 0x29d   :  { %v488_v42 = vadd.f32 %v1487_v32, %v487_v41  ;;  %v1572_v30 = vpop.f32.mrb[1].mxu1  ;;  %v767_v41 = vpack.c.bf16 %v2013_v8, %v2011_v7  ;;  %v769_v7 = vpack.c.bf16 %v2035_v19, %v2033_v18  ;;  %v770_v8 = vpack.c.bf16 %v2041_v24, %v2037_v20  ;;  %v2533_v18 = vld [vmem:[#allocation17_spill] sm:$0xff]  ;;  %v2534_v19 = vld [vmem:[#allocation18_spill] sm:$0xff] }
 0x29e   :  { %v490_v43 = vpop.f32.mrb[2].mxu1  ;;  %v1665_v30 = vld [vmem:[%s2505_s8 + $0x8] sm:$0xff]   ;;  %v774_v20 = vpack.c.bf16 %v2534_v19, %v2533_v18 }
 0x29f   :  { %v494_v46 = vmul.f32 %v488_v42, %v488_v42  ;;  %v491_v47 = vadd.f32 %v1487_v32, %v490_v43  ;;  %v1573_v48 = vpop.f32.mrb[3].mxu1  ;;  %v1664_v32 = vld [vmem:[%s2505_s8] sm:$0xff]   ;;  %v2532_v43 = vld [vmem:[#allocation16_spill] sm:$0xff]  ;;  %s1864_s8 = smov 32  }
 0x2a0   :  { %1587 = vmatpush3.bf16.msra.mxu1 %v1664_v32 }
 0x2a1   :  { %v496_v6 = vmul.f32 %v494_v46, %v488_v42  ;;  %v495_v49 = vmul.f32 %v491_v47, %v491_v47  ;;  %1588 = vmatprep.subr.bf16.mxu1 %v2531_v29  ;;  %v773_v46 = vpack.c.bf16 %v2532_v43, %v2043_v25 }
 0x2a3   :  { %v498_v51 = vmul.f32 0.044715, %v496_v6  ;;  %v497_v44 = vmul.f32 %v495_v49, %v491_v47 }
 0x2a4   :  { %1589 = vmatpush3.bf16.msra.mxu1 %v1665_v30 }
 0x2a5   :  { %v500_v52 = vadd.f32 %v498_v51, %v488_v42  ;;  %v499_v0 = vmul.f32 0.044715, %v497_v44  ;;  %1594 = vmatprep.subr.bf16.mxu1 %v2531_v29  ;;  %v1666_v51 = vld [vmem:[%s2507_s10] sm:$0xff]  }
 0x2a7   :  { %v502_v56 = vmul.f32 0.7978846, %v500_v52  ;;  %v501_v45 = vadd.f32 %v499_v0, %v491_v47  ;;  %v1667_v52 = vld [vmem:[%s2507_s10 + $0x8] sm:$0xff]  }
 0x2a9   :  { %1674 = vtanh.f32 %v502_v56  ;;  %v503_v53 = vmul.f32 0.7978846, %v501_v45 }
 0x2ab   :  { %1676 = vtanh.f32 %v503_v53 }
 0x2b3   :  { %v1675_v54 = vpop.eup %1674 }
 0x2b4   :  { %v506_v55 = vadd.f32 1.0, %v1675_v54 }
 0x2b5   :  { %v1677_v57 = vpop.eup %1676 }
 0x2b6   :  { %v508_v58 = vmul.f32 0.5, %v506_v55  ;;  %v507_v59 = vadd.f32 1.0, %v1677_v57 }
 0x2b8   :  { %v509_v60 = vmul.f32 0.5, %v507_v59  ;;  %v510_v61 = vmul.f32 %v508_v58, %v488_v42  ;;  %v768_v42 = vpack.c.bf16 %v2017_v10, %v2015_v9  ;;  %v771_v9 = vpack.c.bf16 %v2025_v14, %v2023_v13 }
 0x2b9   :  { %v772_v10 = vpack.c.bf16 %v2029_v16, %v2027_v15 }
 0x2ba   :  { %v511_v62 = vmul.f32 %v509_v60, %v491_v47 }
 0x2bc   :  { %v512_v63 = vpack.c.bf16 %v511_v62, %v510_v61 }
 0x2be   :  { %1583 = vmatmul.mubr.msk.bf16.vlgmr.msra.gmra.mrb[4].mxu0 %vm552_vm10, %v512_v63 }
 0x2bf   :  { %1603 = vmatpush3.bf16.msra.mxu0 %v1663_v40  ;;  %1604 = vmatprep.mubr.msk.bf16.mxu0 %vm111_vm1, %v767_v41 }
 0x2c6   :  { %1605 = vmatmul.mubr.msk.bf16.vlgmr.msra.gmra.mrb[8].mxu0 %vm111_vm1, %v768_v42 }
 0x2c7   :  { %1608 = vmatprep.mubr.msk.bf16.mxu0 %vm111_vm1, %v769_v7 }
 0x2ce   :  { %1609 = vmatmul.mubr.msk.bf16.gmra.mrb[12].mxu0 %vm111_vm1, %v770_v8 }
 0x2cf   :  { %1612 = vmatprep.mubr.msk.bf16.mxu0 %vm111_vm1, %v771_v9 }
 0x2d6   :  { %1613 = vmatmul.mubr.msk.bf16.gmra.mrb[16].mxu0 %vm111_vm1, %v772_v10 }
 0x2d7   :  { %1616 = vmatprep.mubr.msk.bf16.mxu0 %vm111_vm1, %v773_v46 }
 0x2de   :  { %1617 = vmatmul.mubr.msk.bf16.gmra.mrb[20].mxu0 %vm111_vm1, %v774_v20 }
 0x391   :  { %v590_v1 = vpop.f32.mrb[4].mxu0 }
 0x392   :  { %v591_v2 = vadd.f32 %v1491_v4, %v590_v1  ;;  %v1584_v3 = vpop.f32.mrb[5].mxu0 }
 0x393   :  { %v593_v5 = vpop.f32.mrb[6].mxu0 }
 0x394   :  { %v594_v22 = vadd.f32 %v1491_v4, %v593_v5  ;;  %v1585_v23 = vpop.f32.mrb[7].mxu0  ;;  %v597_v31 = vadd.f32 %v591_v2, %v2098_v50 }
 0x396   :  { %v599_v27 = vsel %vm449_vm9, %v597_v31, 0.0  ;;  %v598_v28 = vadd.f32 %v594_v22, %v2100_v35 }
 0x397   :  { %600 = vadd.xlane.f32.xlu1 %v599_v27  ;;  %v1865_v27 = vmov 1966171168  }
 0x398   :  { %v602_v11 = vsel %vm449_vm9, %v598_v28, 0.0 }
 0x399   :  { %v2181_v0 = vpop.f32.mrb[8].mxu0 }
 0x39a   :  { %v2183_v56 = vpop.f32.mrb[9].mxu0 }
 0x39b   :  { %603 = vadd.xlane.f32.xlu1 %v602_v11  ;;  %v2185_v45 = vpop.f32.mrb[10].mxu0  ;;  %v910_v11 = vlaneseq }
 0x39c   :  { %v2187_v53 = vpop.f32.mrb[11].mxu0 }
 0x3a1   :  { %v2189_v54 = vpop.f32.mrb[12].mxu0 }
 0x3a2   :  { %v2191_v55 = vpop.f32.mrb[13].mxu0 }
 0x3a3   :  { %v2193_v57 = vpop.f32.mrb[14].mxu0 }
 0x3a4   :  { %v2195_v58 = vpop.f32.mrb[15].mxu0 }
 0x424   :  { %v601_v12 = vpop.xlane.xlu1 %600 }
 0x425   :  { %v606_v17 = vmul.f32 0.03125, %v601_v12  ;;  %v1497_v12 = vld [vmem:[%s2506_s9] ss:$0 sm:$0xff] }
 0x427   :  { %v608_v21 = vsub.f32 %v597_v31, %v606_v17  ;;  %v1668_v31 = vld [vmem:[%s2510_s13] sm:$0xff]  }
 0x428   :  { %v604_v33 = vpop.xlane.xlu1 %603 }
 0x429   :  { %v607_v34 = vmul.f32 0.03125, %v604_v33  ;;  %v610_v37 = vmul.f32 %v608_v21, %v608_v21 }
 0x42b   :  { %v609_v36 = vsub.f32 %v598_v28, %v607_v34  ;;  %v612_v26 = vsel %vm449_vm9, %v610_v37, 0.0  ;;  %v908_v28 = vunpack.c.l.s4 %v1865_v27  ;;  %v911_v37 = vshrl.u32 %v910_v11, 7 }
 0x42c   :  { %613 = vadd.xlane.f32.xlu0 %v612_v26 }
 0x42d   :  { %v611_v38 = vmul.f32 %v609_v36, %v609_v36  ;;  %v909_v34 = vunpack.c.0.s8 %v908_v28  ;;  %v2231_v42 = vsub.s32 0, %v911_v37 }
 0x42f   :  { %v615_v39 = vsel %vm449_vm9, %v611_v38, 0.0 }
 0x430   :  { %616 = vadd.xlane.f32.xlu1 %v615_v39  ;;  %v2228_v39 = vsub.s32 %v909_v34, %v911_v37 }
 0x4b9   :  { %v614_v24 = vpop.xlane.xlu0 %613 }
 0x4ba   :  { %v618_v47 = vmul.f32 0.03125, %v614_v24 }
 0x4bc   :  { %v620_v13 = vadd.f32 1e-05, %v618_v47 }
 0x4bd   :  { %v617_v14 = vpop.xlane.xlu1 %616 }
 0x4be   :  { %1678 = vrsqrt.f32 %v620_v13  ;;  %v619_v15 = vmul.f32 0.03125, %v617_v14  ;;  %v2241_v13 = vld [vmem:[%s2509_s12] ss:$0 sm:$0xff]  ;;  %s1866_s12 = smov [#allocation9]  }
 0x4bf   :  { %s1452_s28 = sshll.u32 %s1866_s12, 4  ;;  %s1453_s28 = int_to_ptr.vmem [resolvable:$true] %s1452_s28 }
 0x4c0   :  { %v621_v16 = vadd.f32 1e-05, %v619_v15  ;;  %s1780_s20 = scalar_lea.vmem %s1453_s28, 256  ;;  %p1785_p11 = scmp.lt.s32.totalorder %s1453_s28, %s1453_s28 }
 0x4c1   :  { %p1781_p10 = scmp.ne.s32.totalorder %s1453_s28, %s1780_s20  ;;  %p1786_p12 = scmp.lt.s32.totalorder %s1780_s20, %s1780_s20 }
 0x4c2   :  { %1680 = vrsqrt.f32 %v621_v16 }
 0x4c3   :  { %p1787_p13 = por %p1786_p12, %p1785_p11 }
 0x4c5   :  { %p1788_p0 = pnand %p1787_p13, %p1781_p10 }
 0x4c8   :  { %v1679_v25 = vpop.eup %1678 }
 0x4c9   :  { %v624_v48 = vmul.f32 %v1679_v25, %v608_v21 }
 0x4cb   :  { %698 = vrot.lane.b32.xlu1 %v624_v48, %s1864_s8 }
 0x4cc   :  { %v1681_v6 = vpop.eup %1680 }
 0x4cd   :  { %v625_v49 = vmul.f32 %v1681_v6, %v609_v36 }
 0x4cf   :  { %700 = vrot.lane.b32.xlu1 %v625_v49, %s1864_s8  ;;  %v626_v44 = vpack.c.bf16 %v625_v49, %v624_v48 }
 0x4d1   :  { %1591 = vmatmul.mubr.msk.bf16.vlgmr.msra.gmra.mrb[4].mxu1 %vm449_vm9, %v626_v44 }
 0x4d2   :  { %1595 = vmatpush3.bf16.msra.mxu1 %v1666_v51  ;;  %1598 = vmatprep.mubr.msk.bf16.mxu1 %vm1863_vm0, %v2531_v29 }
 0x4d3   :  { %1596 = vmatprep.subr.bf16.mxu1 %v2531_v29  ;;  %v2197_v29 = vpop.f32.mrb[16].mxu0 }
 0x4d4   :  { %v2199_v59 = vpop.f32.mrb[17].mxu0 }
 0x4d5   :  { %v2204_v4 = vpop.f32.mrb[18].mxu0 }
 0x4d6   :  { %1597 = vmatpush3.bf16.msra.mxu1 %v1667_v52  ;;  %v2208_v2 = vpop.f32.mrb[19].mxu0 }
 0x4d7   :  { %v2211_v5 = vpop.f32.mrb[20].mxu0  ;;  %1620 = vmatprep.subr.bf16.mxu1 %v1668_v31 }
 0x4d8   :  { %v2213_v22 = vpop.f32.mrb[21].mxu0 }
 0x4d9   :  { %1599 = vmatmul.mubr.msk.bf16.vlgmr.msra.gmra.mrb[8].mxu1 %vm449_vm9, %v626_v44  ;;  %v2215_v23 = vpop.f32.mrb[22].mxu0 }
 0x4da   :  { %1621 = vmatpush3.bf16.msra.mxu1 %v1668_v31 }
 0x53d   :  { %v699_v60 = vpop.permute.xlu1 %698 }
 0x53e   :  { %v704_v61 = vsel %vm449_vm9, %v2098_v50, %v699_v60  ;;  %v2217_v50 = vpop.f32.mrb[23].mxu0 }
 0x53f   :  { %v706_v62 = vsel %vm552_vm10, %v704_v61, 0.0 }
 0x540   :  { %708 = vst [vmem:[#allocation8] sm:$0xff] %v706_v62 }
 0x541   :  { %v701_v63 = vpop.permute.xlu1 %700 }
 0x542   :  { %v705_v1 = vsel %vm449_vm9, %v2100_v35, %v701_v63  ;;  %v1669_v35 = vld [vmem:[%s2510_s13 + $0x8] sm:$0xff]  }
 0x543   :  { %v707_v3 = vsel %vm552_vm10, %v705_v1, 0.0  ;;  %1622 = vmatprep.subr.bf16.mxu1 %v1669_v35 }
 0x544   :  { %709 = vst [vmem:[#allocation8 + $0x8] sm:$0xff] %v707_v3  ;;  %1623 = vmatpush3.bf16.msra.mxu1 %v1669_v35 }
 0x5a4   :  { %v687_v17 = vpop.f32.mrb[4].mxu1 }
 0x5a5   :  { %v688_v21 = vadd.f32 %v1497_v12, %v687_v17  ;;  %v1592_v33 = vpop.f32.mrb[5].mxu1 }
 0x5a6   :  { %v690_v36 = vpop.f32.mrb[6].mxu1 }
 0x5a7   :  { %694 = vst [vmem:[#allocation9] sm:$0xff] %v688_v21  ;;  %v691_v26 = vadd.f32 %v1497_v12, %v690_v36  ;;  %v1593_v38 = vpop.f32.mrb[7].mxu1 }
 0x5a9   :  { %695 = vst [vmem:[#allocation9 + $0x8] sm:$0xff] %v691_v26 }
 0x5ac   :  { %v760_v40 = vpop.f32.mrb[8].mxu1 }
 0x5ad   :  { %v906_v32 = vcombine.high %v760_v40, %v760_v40  ;;  %v913_v41 = vrot.slane %v760_v40, %v2228_v39  ;;  %v1600_v30 = vpop.f32.mrb[9].mxu1 }
 0x5ae   :  { %v763_v7 = vpop.f32.mrb[10].mxu1 }
 0x5af   :  { %v920_v8 = vrot.slane %v906_v32, %v2228_v39  ;;  %v921_v9 = vcombine.high %v913_v41, %v913_v41  ;;  %v929_v10 = vrot.slane %v913_v41, %v2228_v39  ;;  %v955_v43 = vcombine.high %v763_v7, %v763_v7  ;;  %v1601_v46 = vpop.f32.mrb[11].mxu1 }
 0x5b0   :  { %v962_v18 = vrot.slane %v763_v7, %v2228_v39 }
 0x5b1   :  { %v922_v19 = vcombine.high %v920_v8, %v920_v8  ;;  %v936_v20 = vrot.slane %v920_v8, %v2228_v39  ;;  %v951_v24 = vcombine.high %v929_v10, %v929_v10  ;;  %v1007_v47 = vrot.slane %v929_v10, %v2231_v42 }
 0x5b2   :  { %v943_v14 = vrot.slane %v921_v9, %v2228_v39  ;;  %v2245_v15 = vrot.slane %v955_v43, %v2228_v39  ;;  %v970_v16 = vcombine.high %v962_v18, %v962_v18  ;;  %v2248_v25 = vrot.slane %v962_v18, %v2228_v39 }
 0x5b3   :  { %v1015_v48 = vrot.slane %v951_v24, %v2231_v42  ;;  %v1084_v6 = vadd.f32 %v1007_v47, %v2183_v56  ;;  %v952_v49 = vcombine.high %v936_v20, %v936_v20  ;;  %v1023_v51 = vrot.slane %v936_v20, %v2231_v42 }
 0x5b4   :  { %v953_v44 = vcombine.high %v943_v14, %v943_v14  ;;  %v1011_v52 = vrot.slane %v943_v14, %v2231_v42  ;;  %v971_v60 = vcombine.high %v2245_v15, %v2245_v15  ;;  %v2258_v61 = vrot.slane %v2245_v15, %v2228_v39 }
 0x5b5   :  { %v1086_v62 = vadd.f32 %v2181_v0, %v1015_v48  ;;  %v2262_v63 = vadd.f32 %v2241_v13, %v1084_v6  ;;  %v1031_v56 = vrot.slane %v952_v49, %v2231_v42  ;;  %v2266_v1 = vrot.slane %v970_v16, %v2228_v39 }
 0x5b6   :  { %v1019_v3 = vrot.slane %v953_v44, %v2231_v42  ;;  %v1085_v31 = vadd.f32 %v1011_v52, %v2187_v53  ;;  %v1088_v35 = vadd.f32 %v1023_v51, %v2191_v55  ;;  %v950_v27 = vrot.slane %v922_v19, %v2228_v39 }
 0x5b7   :  { %v2273_v28 = vadd.f32 %v2241_v13, %v1086_v62  ;;  %v1123_v0 = vmul.f32 %v2262_v63, %v2262_v63  ;;  %v1090_v11 = vadd.f32 %v2189_v54, %v1031_v56  ;;  %v1000_v12 = vcombine.high %v2248_v25, %v2248_v25 }
 0x5b8   :  { %v1087_v17 = vadd.f32 %v2185_v45, %v1019_v3  ;;  %v2282_v21 = vadd.f32 %v2241_v13, %v1085_v31  ;;  %v2285_v53 = vadd.f32 %v2241_v13, %v1088_v35  ;;  %v954_v55 = vcombine.high %v950_v27, %v950_v27 }
 0x5b9   :  { %v1125_v33 = vmul.f32 %v2273_v28, %v2273_v28  ;;  %v2290_v34 = vmul.f32 %v1123_v0, %v2262_v63  ;;  %v2293_v54 = vadd.f32 %v2241_v13, %v1090_v11  ;;  %v1027_v37 = vrot.slane %v950_v27, %v2231_v42 }
 0x5ba   :  { %v2297_v45 = vadd.f32 %v2241_v13, %v1087_v17  ;;  %v1124_v36 = vmul.f32 %v2282_v21, %v2282_v21  ;;  %v1127_v26 = vmul.f32 %v2285_v53, %v2285_v53  ;;  %v1035_v38 = vrot.slane %v954_v55, %v2231_v42 }
 0x5bb   :  { %v1141_v40 = vmul.f32 %v1125_v33, %v2273_v28  ;;  %v1129_v32 = vmul.f32 %v2293_v54, %v2293_v54  ;;  %v1089_v41 = vadd.f32 %v1027_v37, %v2195_v58  ;;  %v1047_v30 = vrot.slane %v1000_v12, %v2231_v42 }
 0x5bc   :  { %v1126_v7 = vmul.f32 %v2297_v45, %v2297_v45  ;;  %v1140_v8 = vmul.f32 %v1124_v36, %v2282_v21  ;;  %v1143_v9 = vmul.f32 %v1127_v26, %v2285_v53  ;;  %v1091_v10 = vadd.f32 %v2193_v57, %v1035_v38 }
 0x5bd   :  { %v1157_v43 = vmul.f32 0.044715, %v1141_v40  ;;  %v1145_v46 = vmul.f32 %v1129_v32, %v2293_v54  ;;  %v2316_v18 = vadd.f32 %v2241_v13, %v1089_v41  ;;  %v1094_v19 = vadd.f32 %v2197_v29, %v1047_v30 }
 0x5be   :  { %v1142_v58 = vmul.f32 %v1126_v7, %v2297_v45  ;;  %v1156_v20 = vmul.f32 0.044715, %v1140_v8  ;;  %v1159_v24 = vmul.f32 0.044715, %v1143_v9  ;;  %v2321_v47 = vadd.f32 %v2241_v13, %v1091_v10 }
 0x5bf   :  { %v2324_v14 = vadd.f32 %v1157_v43, %v2273_v28  ;;  %v1161_v16 = vmul.f32 0.044715, %v1145_v46  ;;  %v1128_v57 = vmul.f32 %v2316_v18, %v2316_v18  ;;  %v2329_v48 = vadd.f32 %v2241_v13, %v1094_v19 }
 0x5c0   :  { %v2331_v6 = vmul.f32 0.044715, %v1142_v58  ;;  %v1172_v29 = vadd.f32 %v1156_v20, %v2282_v21  ;;  %v1175_v49 = vadd.f32 %v1159_v24, %v2285_v53  ;;  %v1130_v51 = vmul.f32 %v2321_v47, %v2321_v47 }
 0x5c1   :  { %v1177_v44 = vadd.f32 %v1161_v16, %v2293_v54  ;;  %v1144_v52 = vmul.f32 %v1128_v57, %v2316_v18  ;;  %v1133_v62 = vmul.f32 %v2329_v48, %v2329_v48  ;;  %v1039_v56 = vrot.slane %v2248_v25, %v2231_v42 }
 0x5c2   :  { %v1188_v3 = vmul.f32 0.7978846, %v1172_v29  ;;  %v1191_v31 = vmul.f32 0.7978846, %v1175_v49  ;;  %v1146_v35 = vmul.f32 %v1130_v51, %v2321_v47  ;;  %v1002_v27 = vcombine.high %v2266_v1, %v2266_v1 }
 0x5c3   :  { %v1193_v0 = vmul.f32 0.7978846, %v1177_v44  ;;  %v1160_v11 = vmul.f32 0.044715, %v1144_v52  ;;  %v1149_v12 = vmul.f32 %v1133_v62, %v2329_v48  ;;  %v1092_v17 = vadd.f32 %v1039_v56, %v2199_v59 }
 0x5c4   :  { %1682 = vtanh.f32 %v1188_v3  ;;  %v1162_v55 = vmul.f32 0.044715, %v1146_v35  ;;  %v1051_v33 = vrot.slane %v1002_v27, %v2231_v42  ;;  %v1043_v25 = vrot.slane %v2266_v1, %v2231_v42 }
 0x5c5   :  { %1684 = vtanh.f32 %v1193_v0  ;;  %v1176_v37 = vadd.f32 %v1160_v11, %v2316_v18  ;;  %v1165_v36 = vmul.f32 0.044715, %v1149_v12  ;;  %v2353_v26 = vadd.f32 %v2241_v13, %v1092_v17 }
 0x5c6   :  { %1686 = vtanh.f32 %v1191_v31  ;;  %v1178_v38 = vadd.f32 %v1162_v55, %v2321_v47  ;;  %v1095_v40 = vadd.f32 %v2204_v4, %v1051_v33  ;;  %v1093_v59 = vadd.f32 %v1043_v25, %v2208_v2 }
 0x5c7   :  { %v1192_v32 = vmul.f32 0.7978846, %v1176_v37  ;;  %v1181_v41 = vadd.f32 %v1165_v36, %v2329_v48  ;;  %v1131_v1 = vmul.f32 %v2353_v26, %v2353_v26  ;;  %v1001_v30 = vcombine.high %v2258_v61, %v2258_v61 }
 0x5c8   :  { %v1194_v7 = vmul.f32 0.7978846, %v1178_v38  ;;  %v2364_v8 = vadd.f32 %v2241_v13, %v1095_v40  ;;  %v2367_v9 = vadd.f32 %v2241_v13, %v1093_v59  ;;  %v1055_v4 = vrot.slane %v2258_v61, %v2231_v42 }
 0x5c9   :  { %1688 = vtanh.f32 %v1192_v32  ;;  %v1197_v2 = vmul.f32 0.7978846, %v1181_v41  ;;  %v1147_v10 = vmul.f32 %v1131_v1, %v2353_v26  ;;  %v1063_v43 = vrot.slane %v1001_v30, %v2231_v42 }
 0x5ca   :  { %1690 = vtanh.f32 %v1194_v7  ;;  %v1134_v46 = vmul.f32 %v2364_v8, %v2364_v8  ;;  %v1132_v19 = vmul.f32 %v2367_v9, %v2367_v9  ;;  %v1096_v58 = vadd.f32 %v1055_v4, %v2213_v22 }
 0x5cb   :  { %1692 = vtanh.f32 %v1197_v2  ;;  %v1163_v20 = vmul.f32 0.044715, %v1147_v10  ;;  %v1098_v24 = vadd.f32 %v2211_v5, %v1063_v43  ;;  %v999_v61 = vrot.slane %v971_v60, %v2228_v39 }
 0x5cc   :  { %v1150_v16 = vmul.f32 %v1134_v46, %v2364_v8  ;;  %v1148_v57 = vmul.f32 %v1132_v19, %v2367_v9  ;;  %v2386_v29 = vadd.f32 %v2241_v13, %v1096_v58  ;;  %v1155_v49 = vmul.f32 0.044715, %v2290_v34 }
 0x5cd   :  { %v1179_v22 = vadd.f32 %v1163_v20, %v2353_v26  ;;  %v2391_v51 = vadd.f32 %v2241_v13, %v1098_v24  ;;  %v1003_v5 = vcombine.high %v999_v61, %v999_v61  ;;  %v1059_v44 = vrot.slane %v999_v61, %v2231_v42 }
 0x5ce   :  { %v1683_v52 = vpop.eup %1682  ;;  %v1166_v15 = vmul.f32 0.044715, %v1150_v16  ;;  %v1164_v39 = vmul.f32 0.044715, %v1148_v57  ;;  %v1135_v60 = vmul.f32 %v2386_v29, %v2386_v29  ;;  %v1171_v62 = vadd.f32 %v1155_v49, %v2262_v63 }
 0x5cf   :  { %v1685_v56 = vpop.eup %1684  ;;  %v1195_v3 = vmul.f32 0.7978846, %v1179_v22  ;;  %v1137_v34 = vmul.f32 %v2391_v51, %v2391_v51  ;;  %v1067_v31 = vrot.slane %v1003_v5, %v2231_v42  ;;  %v1097_v35 = vadd.f32 %v1059_v44, %v2217_v50 }
 0x5d0   :  { %v1687_v27 = vpop.eup %1686  ;;  %v1182_v0 = vadd.f32 %v1166_v15, %v2364_v8  ;;  %v1180_v11 = vadd.f32 %v1164_v39, %v2367_v9  ;;  %v1151_v12 = vmul.f32 %v1135_v60, %v2386_v29  ;;  %v1187_v17 = vmul.f32 0.7978846, %v1171_v62 }
 0x5d1   :  { %1694 = vtanh.f32 %v1195_v3  ;;  %v1153_v55 = vmul.f32 %v1137_v34, %v2391_v51  ;;  %v1099_v33 = vadd.f32 %v2215_v23, %v1067_v31  ;;  %v2407_v25 = vadd.f32 %v2241_v13, %v1097_v35 }
 0x5d2   :  { %v1198_v37 = vmul.f32 0.7978846, %v1182_v0  ;;  %v1196_v42 = vmul.f32 0.7978846, %v1180_v11  ;;  %v1167_v36 = vmul.f32 0.044715, %v1151_v12  ;;  %1696 = vtanh.f32 %v1187_v17 }
 0x5d3   :  { %v1689_v50 = vpop.eup %1688  ;;  %v1169_v38 = vmul.f32 0.044715, %v1153_v55  ;;  %v2410_v40 = vadd.f32 %v2241_v13, %v1099_v33  ;;  %v1136_v59 = vmul.f32 %v2407_v25, %v2407_v25  ;;  %v1220_v32 = vadd.f32 1.0, %v1683_v52 }
 0x5d4   :  { %v1691_v41 = vpop.eup %1690  ;;  %1698 = vtanh.f32 %v1198_v37  ;;  %v1183_v23 = vadd.f32 %v1167_v36, %v2386_v29  ;;  %v1174_v1 = vadd.f32 %v2331_v6, %v2297_v45  ;;  %v1189_v30 = vmul.f32 0.7978846, %v2324_v14 }
 0x5d5   :  { %v1693_v7 = vpop.eup %1692  ;;  %1700 = vtanh.f32 %v1196_v42  ;;  %v1185_v4 = vadd.f32 %v1169_v38, %v2391_v51  ;;  %v1138_v13 = vmul.f32 %v2410_v40, %v2410_v40  ;;  %v1152_v2 = vmul.f32 %v1136_v59, %v2407_v25 }
 0x5d6   :  { %v1199_v10 = vmul.f32 0.7978846, %v1183_v23  ;;  %v1190_v43 = vmul.f32 0.7978846, %v1174_v1  ;;  %1702 = vtanh.f32 %v1189_v30  ;;  %v1223_v20 = vadd.f32 1.0, %v1687_v27 }
 0x5d7   :  { %v1201_v46 = vmul.f32 0.7978846, %v1185_v4  ;;  %v1154_v19 = vmul.f32 %v1138_v13, %v2410_v40  ;;  %v1168_v58 = vmul.f32 0.044715, %v1152_v2  ;;  %v1236_v6 = vmul.f32 0.5, %v1220_v32 }
 0x5d8   :  { %1704 = vtanh.f32 %v1199_v10  ;;  %v1224_v14 = vadd.f32 1.0, %v1689_v50  ;;  %v1225_v24 = vadd.f32 1.0, %v1685_v56  ;;  %v1239_v57 = vmul.f32 0.5, %v1223_v20 }
 0x5d9   :  { %1706 = vtanh.f32 %v1201_v46  ;;  %v1170_v61 = vmul.f32 0.044715, %v1154_v19  ;;  %v1184_v16 = vadd.f32 %v1168_v58, %v2407_v25  ;;  %v1226_v22 = vadd.f32 1.0, %v1691_v41 }
 0x5da   :  { %1708 = vtanh.f32 %v1190_v43  ;;  %v1240_v49 = vmul.f32 0.5, %v1224_v14  ;;  %v1241_v5 = vmul.f32 0.5, %v1225_v24  ;;  %v1229_v39 = vadd.f32 1.0, %v1693_v7 }
 0x5db   :  { %v1695_v44 = vpop.eup %1694  ;;  %v1186_v52 = vadd.f32 %v1170_v61, %v2410_v40  ;;  %v1200_v15 = vmul.f32 0.7978846, %v1184_v16  ;;  %v1255_v62 = vmul.f32 %v1239_v57, %v2285_v53  ;;  %v1242_v56 = vmul.f32 0.5, %v1226_v22 }
 0x5dc   :  { %v1697_v60 = vpop.eup %1696  ;;  %v1256_v3 = vmul.f32 %v1240_v49, %v2316_v18  ;;  %v1227_v34 = vadd.f32 1.0, %v1695_v44  ;;  %v1252_v0 = vmul.f32 %v1236_v6, %v2282_v21  ;;  %v1257_v12 = vmul.f32 %v1241_v5, %v2293_v54 }
 0x5dd   :  { %v1202_v31 = vmul.f32 0.7978846, %v1186_v52  ;;  %1710 = vtanh.f32 %v1200_v15  ;;  %v1219_v35 = vadd.f32 1.0, %v1697_v60  ;;  %v1258_v17 = vmul.f32 %v1242_v56, %v2321_v47 }
 0x5de   :  { %v1699_v27 = vpop.eup %1698  ;;  %v1269_v11 = vpack.c.bf16 %v1256_v3, %v1255_v62  ;;  %v1245_v53 = vmul.f32 0.5, %v1229_v39  ;;  %v1243_v50 = vmul.f32 0.5, %v1227_v34 }
 0x5df   :  { %v1701_v55 = vpop.eup %1700  ;;  %1712 = vtanh.f32 %v1202_v31  ;;  %v1235_v33 = vmul.f32 0.5, %v1219_v35  ;;  %v1230_v37 = vadd.f32 1.0, %v1699_v27  ;;  %v1270_v18 = vpack.c.bf16 %v1258_v17, %v1257_v12 }
 0x5e0   :  { %v1703_v42 = vpop.eup %1702  ;;  %v1228_v36 = vadd.f32 1.0, %v1701_v55  ;;  %v1261_v54 = vmul.f32 %v1245_v53, %v2329_v48  ;;  %v1259_v7 = vmul.f32 %v1243_v50, %v2353_v26 }
 0x5e1   :  { %v1251_v38 = vmul.f32 %v1235_v33, %v2262_v63  ;;  %v1221_v59 = vadd.f32 1.0, %v1703_v42  ;;  %v1246_v32 = vmul.f32 0.5, %v1230_v37 }
 0x5e2   :  { %v1705_v41 = vpop.eup %1704  ;;  %v1244_v21 = vmul.f32 0.5, %v1228_v36 }
 0x5e3   :  { %v1707_v23 = vpop.eup %1706  ;;  %v1267_v1 = vpack.c.bf16 %v1252_v0, %v1251_v38  ;;  %v1262_v47 = vmul.f32 %v1246_v32, %v2364_v8  ;;  %v1231_v13 = vadd.f32 1.0, %v1705_v41  ;;  %v1237_v63 = vmul.f32 0.5, %v1221_v59 }
 0x5e4   :  { %v1709_v30 = vpop.eup %1708  ;;  %v1260_v4 = vmul.f32 %v1244_v21, %v2367_v9  ;;  %v1233_v46 = vadd.f32 1.0, %v1707_v23 }
 0x5e5   :  { %1624 = vmatprep.mubr.msk.bf16.mxu1 %vm449_vm9, %v1267_v1  ;;  %v1222_v2 = vadd.f32 1.0, %v1709_v30  ;;  %v1272_v10 = vpack.c.bf16 %v1262_v47, %v1261_v54  ;;  %v1247_v6 = vmul.f32 0.5, %v1231_v13  ;;  %v1253_v8 = vmul.f32 %v1237_v63, %v2273_v28 }
 0x5e6   :  { %v1271_v43 = vpack.c.bf16 %v1260_v4, %v1259_v7  ;;  %v1249_v9 = vmul.f32 0.5, %v1233_v46 }
 0x5e7   :  { %v1711_v19 = vpop.eup %1710  ;;  %v1238_v58 = vmul.f32 0.5, %v1222_v2  ;;  %v1263_v16 = vmul.f32 %v1247_v6, %v2386_v29 }
 0x5e8   :  { %v1232_v20 = vadd.f32 1.0, %v1711_v19  ;;  %v1265_v5 = vmul.f32 %v1249_v9, %v2391_v51 }
 0x5e9   :  { %v1713_v48 = vpop.eup %1712  ;;  %v1254_v14 = vmul.f32 %v1238_v58, %v2297_v45 }
 0x5ea   :  { %v1248_v26 = vmul.f32 0.5, %v1232_v20  ;;  %v1234_v24 = vadd.f32 1.0, %v1713_v48 }
 0x5eb   :  { %v1268_v61 = vpack.c.bf16 %v1254_v14, %v1253_v8 }
 0x5ec   :  { %v1264_v57 = vmul.f32 %v1248_v26, %v2407_v25  ;;  %v1250_v49 = vmul.f32 0.5, %v1234_v24 }
 0x5ed   :  { %1625 = vmatmul.mubr.msk.bf16.vlgmr.msra.gmra.mrb[12].mxu1 %vm449_vm9, %v1268_v61 }
 0x5ee   :  { %1628 = vmatprep.mubr.msk.bf16.mxu1 %vm449_vm9, %v1269_v11  ;;  %v1273_v22 = vpack.c.bf16 %v1264_v57, %v1263_v16  ;;  %v1266_v28 = vmul.f32 %v1250_v49, %v2410_v40 }
 0x5f0   :  { %v1274_v44 = vpack.c.bf16 %v1266_v28, %v1265_v5 }
 0x5f5   :  { %1629 = vmatmul.mubr.msk.bf16.gmra.mrb[16].mxu1 %vm449_vm9, %v1270_v18 }
 0x5f6   :  { %1632 = vmatprep.mubr.msk.bf16.mxu1 %vm449_vm9, %v1271_v43 }
 0x5fd   :  { %1633 = vmatmul.mubr.msk.bf16.gmra.mrb[20].mxu1 %vm449_vm9, %v1272_v10 }
 0x5fe   :  { %1636 = vmatprep.mubr.msk.bf16.mxu1 %vm449_vm9, %v1273_v22 }
 0x605   :  { %1637 = vmatmul.mubr.msk.bf16.gmra.mrb[24].mxu1 %vm449_vm9, %v1274_v44 }
 0x606   :  { %1791 = shalt.err (!%p1788_p0)
}
 0x607   :  { %s1792_s7 = scalar_lea.hbm %s2513_s16, 256 }
 0x608   :  { %p1793_p1 = scmp.ne.s32.totalorder %s2513_s16, %s1792_s7  ;;  %p1796_p2 = scmp.lt.u32.totalorder %s1792_s7, %s2513_s16 }
 0x60a   :  { %p1798_p3 = pnand %p1796_p2, %p1793_p1 }
 0x60c   :  { %1801 = shalt.err (!%p1798_p3)
}
 0x60d   :  { %1458 = dma.vmem_to_hbm [thread:$0]  %s1453_s28, 256, %s2513_s16, [#allocation10], %s1858_s2, %s1858_s2, %s1859_s25  }
 0x60e   :  { %s1802_s22 = scalar_lea.vmem %s1441_s1, 256  ;;  %p1807_p5 = scmp.lt.s32.totalorder %s1441_s1, %s1441_s1 }
 0x60f   :  { %p1803_p4 = scmp.ne.s32.totalorder %s1441_s1, %s1802_s22  ;;  %p1808_p6 = scmp.lt.s32.totalorder %s1802_s22, %s1802_s22 }
 0x611   :  { %p1809_p7 = por %p1808_p6, %p1807_p5 }
 0x613   :  { %p1810_p8 = pnand %p1809_p7, %p1803_p4 }
 0x615   :  { %1813 = shalt.err (!%p1810_p8)
}
 0x616   :  { %s1814_s4 = scalar_lea.hbm %s2512_s15, 256 }
 0x617   :  { %p1815_p9 = scmp.ne.s32.totalorder %s2512_s15, %s1814_s4  ;;  %p1818_p10 = scmp.lt.u32.totalorder %s1814_s4, %s2512_s15 }
 0x619   :  { %p1820_p11 = pnand %p1818_p10, %p1815_p9 }
 0x61b   :  { %1823 = shalt.err (!%p1820_p11)
}
 0x61c   :  { %1446 = dma.vmem_to_hbm [thread:$0]  %s1441_s1, 256, %s2512_s15, [#allocation4], %s1858_s2, %s1858_s2, %s1859_s25  }
 0x61d   :  { %v1514_v45 = vld [vmem:[%s2511_s14] ss:$0 sm:$0xff]  ;;  %s1868_s14 = smov [#allocation11]  }
 0x61e   :  { %s1464_s15 = sshll.u32 %s1868_s14, 4  ;;  %s1465_s15 = int_to_ptr.vmem [resolvable:$true] %s1464_s15 }
 0x61f   :  { %s1824_s13 = scalar_lea.vmem %s1465_s15, 2048  ;;  %p1829_p13 = scmp.lt.s32.totalorder %s1465_s15, %s1465_s15 }
 0x620   :  { %p1825_p12 = scmp.ne.s32.totalorder %s1465_s15, %s1824_s13  ;;  %p1830_p0 = scmp.lt.s32.totalorder %s1824_s13, %s1824_s13 }
 0x622   :  { %p1831_p1 = por %p1830_p0, %p1829_p13 }
 0x624   :  { %p1832_p2 = pnand %p1831_p1, %p1825_p12 }
 0x6c0   :  { %v1626_v29 = vpop.f32.mrb[12].mxu1 }
 0x6c1   :  { %v1365_v51 = vadd.f32 %v1626_v29, %v1514_v45  ;;  %v1356_v25 = vpop.f32.mrb[13].mxu1 }
 0x6c2   :  { %v1357_v40 = vadd.f32 %v1514_v45, %v1356_v25  ;;  %v1627_v52 = vpop.f32.mrb[14].mxu1 }
 0x6c3   :  { %1421 = vst [vmem:[#allocation11 + $0x10] sm:$0xff] %v1365_v51  ;;  %v1368_v15 = vadd.f32 %v1627_v52, %v1514_v45  ;;  %v1359_v39 = vpop.f32.mrb[15].mxu1 }
 0x6c4   :  { %1419 = vst [vmem:[#allocation11] sm:$0xff] %v1357_v40  ;;  %v1360_v60 = vadd.f32 %v1514_v45, %v1359_v39 }
 0x6c5   :  { %1422 = vst [vmem:[#allocation11 + $0x18] sm:$0xff] %v1368_v15 }
 0x6c6   :  { %1420 = vst [vmem:[#allocation11 + $0x8] sm:$0xff] %v1360_v60 }
 0x6c8   :  { %v1630_v62 = vpop.f32.mrb[16].mxu1 }
 0x6c9   :  { %v1381_v3 = vadd.f32 %v1630_v62, %v1514_v45  ;;  %v1372_v56 = vpop.f32.mrb[17].mxu1 }
 0x6ca   :  { %v1373_v34 = vadd.f32 %v1514_v45, %v1372_v56  ;;  %v1631_v31 = vpop.f32.mrb[18].mxu1 }
 0x6cb   :  { %1425 = vst [vmem:[#allocation11 + $0x30] sm:$0xff] %v1381_v3  ;;  %v1384_v35 = vadd.f32 %v1631_v31, %v1514_v45  ;;  %v1375_v27 = vpop.f32.mrb[19].mxu1 }
 0x6cc   :  { %1423 = vst [vmem:[#allocation11 + $0x20] sm:$0xff] %v1373_v34  ;;  %v1376_v0 = vadd.f32 %v1514_v45, %v1375_v27 }
 0x6cd   :  { %1426 = vst [vmem:[#allocation11 + $0x38] sm:$0xff] %v1384_v35 }
 0x6ce   :  { %1424 = vst [vmem:[#allocation11 + $0x28] sm:$0xff] %v1376_v0 }
 0x6d0   :  { %v1634_v11 = vpop.f32.mrb[20].mxu1 }
 0x6d1   :  { %v1397_v12 = vadd.f32 %v1634_v11, %v1514_v45  ;;  %v1388_v17 = vpop.f32.mrb[21].mxu1 }
 0x6d2   :  { %v1389_v55 = vadd.f32 %v1514_v45, %v1388_v17  ;;  %v1635_v33 = vpop.f32.mrb[22].mxu1 }
 0x6d3   :  { %1429 = vst [vmem:[#allocation11 + $0x50] sm:$0xff] %v1397_v12  ;;  %v1400_v37 = vadd.f32 %v1635_v33, %v1514_v45  ;;  %v1391_v53 = vpop.f32.mrb[23].mxu1 }
 0x6d4   :  { %1427 = vst [vmem:[#allocation11 + $0x40] sm:$0xff] %v1389_v55  ;;  %v1392_v42 = vadd.f32 %v1514_v45, %v1391_v53 }
 0x6d5   :  { %1430 = vst [vmem:[#allocation11 + $0x58] sm:$0xff] %v1400_v37 }
 0x6d6   :  { %1428 = vst [vmem:[#allocation11 + $0x48] sm:$0xff] %v1392_v42 }
 0x6d8   :  { %v1638_v18 = vpop.f32.mrb[24].mxu1 }
 0x6d9   :  { %v1413_v36 = vadd.f32 %v1638_v18, %v1514_v45  ;;  %v1404_v50 = vpop.f32.mrb[25].mxu1 }
 0x6da   :  { %v1405_v38 = vadd.f32 %v1514_v45, %v1404_v50  ;;  %v1639_v59 = vpop.f32.mrb[26].mxu1 }
 0x6db   :  { %1433 = vst [vmem:[#allocation11 + $0x70] sm:$0xff] %v1413_v36  ;;  %v1416_v32 = vadd.f32 %v1639_v59, %v1514_v45  ;;  %v1407_v41 = vpop.f32.mrb[27].mxu1 }
 0x6dc   :  { %1431 = vst [vmem:[#allocation11 + $0x60] sm:$0xff] %v1405_v38  ;;  %v1408_v21 = vadd.f32 %v1514_v45, %v1407_v41 }
 0x6dd   :  { %1434 = vst [vmem:[#allocation11 + $0x78] sm:$0xff] %v1416_v32 }
 0x6de   :  { %1432 = vst [vmem:[#allocation11 + $0x68] sm:$0xff] %v1408_v21 }
 0x6df   :  { %1835 = shalt.err (!%p1832_p2)
}
 0x6e0   :  { %s2535_s19 = sld [smem:[#allocation21_spill]] }
 0x6e6   :  { %s1836_s1 = scalar_lea.hbm %s2535_s19, 2048 }
 0x6e7   :  { %p1837_p3 = scmp.ne.s32.totalorder %s2535_s19, %s1836_s1  ;;  %p1840_p4 = scmp.lt.u32.totalorder %s1836_s1, %s2535_s19 }
 0x6e9   :  { %p1842_p5 = pnand %p1840_p4, %p1837_p3 }
 0x6eb   :  { %1845 = shalt.err (!%p1842_p5)
}
 0x6ec   :  { %1470 = dma.vmem_to_hbm [thread:$0]  %s1465_s15, 2048, %s2535_s19, [#allocation10], %s1858_s2, %s1858_s2, %s1859_s25  }
 0x6ed   :  { %1850 = dma.done.wait [#allocation4], 256  }
 0x6ee   :  { %1851 = vsyncadd [#allocation4], 4294967040 }
 0x6ef   :  { %1852 = dma.done.wait [#allocation10], 2304  }
 0x6f0   :  { %1853 = vsyncadd [#allocation10], 4294964992 }
 0x6f1   :  { %1480 = vsyncpa [#allocation3], 1 }
 0x6f2   :  { %1481 = vsyncpa [#allocation6], 1 }
 0x6f3   :  { %1482 = vsyncpa [#allocation4], 1 }
 0x6f4   :  { %1483 = vsyncpa [#allocation10], 1 }

</bundles_post_ra>
